<compile_context>
chip_gen: v7x
topology: tpu7x:2x2x1
jax: 0.10.0
libtpu: 0.0.40
codegen_flags: <defaults>
</compile_context>

<pallas_src>
import functools

import jax
import jax.numpy as jnp
from jax.experimental import pallas as pl
from jax.experimental.pallas import tpu as pltpu


# ----------------------------------------------------------------------------
# Fused kernel: embed-gather -> BiLSTM -> hidden2tag -> Viterbi -> backtrace
# ----------------------------------------------------------------------------
def bilstm_crf_kernel(ids_ref,                      # SMEM (T,) int32
                      xproj_f_ref, xproj_b_ref,     # VMEM (V, 8H) each
                      whh_ref,                      # VMEM (2H, 8H)
                      h0_ref, c0_ref,               # VMEM (1, 2H) each  [fwd | bwd]
                      wtag_ref, btag_ref,           # VMEM (2H, K), (1, K)
                      trans_ref,                    # VMEM (K, K)
                      path_ref, score_ref,          # out: (T+1,1) i32, (1,1) f32
                      hseq_scr, feats_scr, bp_scr,  # scratch: (T,2H) f32, (T,K) f32, (T,K) i32
                      *, start_idx, stop_idx):
    T = hseq_scr.shape[0]
    H2 = hseq_scr.shape[1]          # 2H (both directions)
    H = H2 // 2
    G = H2                          # width of each gate group [fwd | bwd]
    K = trans_ref.shape[0]
    NEG = -10000.0

    whh = whh_ref[...]              # (2H, 8H), hoisted out of the loop

    # ---------------- fused fwd+bwd LSTM recurrence (one dot / step) --------
    def lstm_step(t, carry):
        h, c = carry                                         # (1, 2H) each
        # gather per-vocab precomputed x-projections (bias folded in):
        #   fwd direction consumes ids[t], bwd direction consumes ids[T-1-t]
        gx = (xproj_f_ref[pl.ds(ids_ref[t], 1), :]
              + xproj_b_ref[pl.ds(ids_ref[T - 1 - t], 1), :])        # (1, 8H)
        gates = gx + jnp.dot(h, whh, preferred_element_type=jnp.float32)
        sg = jax.nn.sigmoid(gates[:, 0:3 * G])               # [i | f | o]
        gg = jnp.tanh(gates[:, 3 * G:4 * G])                 # g
        i = sg[:, 0:G]
        f = sg[:, G:2 * G]
        o = sg[:, 2 * G:3 * G]
        c_new = f * c + i * gg
        h_new = o * jnp.tanh(c_new)
        # forward half belongs to time t, backward half to time T-1-t
        hseq_scr[pl.ds(t, 1), 0:H] = h_new[:, 0:H]
        hseq_scr[pl.ds(T - 1 - t, 1), H:2 * H] = h_new[:, H:2 * H]
        return (h_new, c_new)

    jax.lax.fori_loop(0, T, lstm_step, (h0_ref[...], c0_ref[...]), unroll=True)

    # ---------------- hidden2tag --------------------------------------------
    feats_scr[...] = (jnp.dot(hseq_scr[...], wtag_ref[...],
                              preferred_element_type=jnp.float32)
                      + btag_ref[...])

    # ---------------- CRF Viterbi forward recurrence -------------------------
    trans = trans_ref[...]                                            # (K, K)
    col_iota = jax.lax.broadcasted_iota(jnp.int32, (1, K), 1)
    prev_iota = jax.lax.broadcasted_iota(jnp.int32, (K, K), 0)
    fv0 = jnp.where(col_iota == start_idx, 0.0, NEG).astype(jnp.float32)

    def vit_step(t, fv):
        feat = feats_scr[pl.ds(t, 1), :]                              # (1, K)
        ntv_t = jnp.transpose(fv + trans)                             # (K,K) [prev, next]
        vmax = jnp.max(ntv_t, axis=0, keepdims=True)                  # (1, K)
        bptr = jnp.min(jnp.where(ntv_t == vmax, prev_iota, K),
                       axis=0, keepdims=True)                         # first-argmax prev
        bp_scr[pl.ds(t, 1), :] = bptr.astype(jnp.int32)
        return vmax + feat

    fv = jax.lax.fori_loop(0, T, vit_step, fv0, unroll=True)

    terminal = fv + trans[stop_idx:stop_idx + 1, :]
    terminal = jnp.where((col_iota == stop_idx) | (col_iota == start_idx),
                         NEG, terminal)
    tmax = jnp.max(terminal, axis=1, keepdims=True)                   # (1, 1)
    best_v = jnp.min(jnp.where(terminal == tmax, col_iota, K),
                     axis=1, keepdims=True).astype(jnp.int32)         # (1, 1)
    score_ref[...] = tmax

    # ---------------- in-kernel backtrace (one-hot selects, no scalar ops) ---
    # path_ref slot layout: slot 0 = start tag, slots 1..T = best_path[0..T-1]
    path_ref[pl.ds(T, 1), :] = best_v

    def bt_step(s, cur_v):
        t = T - 1 - s
        row = bp_scr[pl.ds(t, 1), :]                                  # (1, K) int32
        onehot = col_iota == cur_v                                    # (1, K) bool
        new_v = jnp.max(jnp.where(onehot, row, 0), axis=1, keepdims=True)
        path_ref[pl.ds(t, 1), :] = new_v
        return new_v

    jax.lax.fori_loop(0, T, bt_step, best_v, unroll=True)


# ----------------------------------------------------------------------------
# Model wrapper (parameter setup + packing in plain JAX, done once)
# ----------------------------------------------------------------------------
class BiLSTM_CRF:
    def __init__(self, vocab_size, tag_to_ix, embedding_dim, hidden_dim, key):
        assert hidden_dim % 2 == 0
        self.vocab_size = vocab_size
        self.tag_to_ix = tag_to_ix
        self.tagset_size = len(tag_to_ix)
        self.embedding_dim = embedding_dim
        self.hidden_dim = hidden_dim
        H = hidden_dim // 2
        K = self.tagset_size
        ks = jax.random.split(key, 16)
        s = 1.0 / jnp.sqrt(H)

        self.word_embeds = jax.random.normal(ks[0], (vocab_size, embedding_dim), jnp.float32)

        # raw LSTM params (PyTorch shapes / gate order [i, f, g, o]), fwd + bwd
        self.w_ih_f = jax.random.uniform(ks[1], (4 * H, embedding_dim), jnp.float32, -s, s)
        self.w_hh_f = jax.random.uniform(ks[2], (4 * H, H), jnp.float32, -s, s)
        self.b_ih_f = jax.random.uniform(ks[3], (4 * H,), jnp.float32, -s, s)
        self.b_hh_f = jax.random.uniform(ks[4], (4 * H,), jnp.float32, -s, s)
        self.w_ih_b = jax.random.uniform(ks[5], (4 * H, embedding_dim), jnp.float32, -s, s)
        self.w_hh_b = jax.random.uniform(ks[6], (4 * H, H), jnp.float32, -s, s)
        self.b_ih_b = jax.random.uniform(ks[7], (4 * H,), jnp.float32, -s, s)
        self.b_hh_b = jax.random.uniform(ks[8], (4 * H,), jnp.float32, -s, s)

        # hidden2tag
        self.w_tag = jax.random.uniform(ks[9], (K, hidden_dim), jnp.float32, -s, s)
        self.b_tag = jax.random.uniform(ks[10], (K,), jnp.float32, -s, s)

        # CRF transitions
        trans = jax.random.normal(ks[11], (K, K), jnp.float32)
        trans = trans.at[tag_to_ix['<start>'], :].set(-10000.0)
        trans = trans.at[:, tag_to_ix['<stop>']].set(-10000.0)
        self.transitions = trans

        # TODO(synk): PyTorch re-randomizes init_hidden() on every forward; here
        # h0/c0 are sampled once at construction.
        self.h0 = jax.random.normal(ks[12], (2, H), jnp.float32)
        self.c0 = jax.random.normal(ks[13], (2, H), jnp.float32)

        # --------- pack parameters for the fused kernel ----------------------
        def _split(w):
            return w[0:H], w[H:2 * H], w[2 * H:3 * H], w[3 * H:4 * H]

        def _pack_dir(w_ih, w_hh, b_ih, b_hh):
            wi, wf, wg, wo = _split(w_ih)
            ri, rf, rg, ro = _split(w_hh)
            b = b_ih + b_hh
            bi, bf, bg, bo = b[0:H], b[H:2 * H], b[2 * H:3 * H], b[3 * H:4 * H]
            wx = jnp.concatenate([wi, wf, wo, wg], axis=0)     # (4H, E) order [i,f,o,g]
            wr = jnp.concatenate([ri, rf, ro, rg], axis=0)     # (4H, H)
            bb = jnp.concatenate([bi, bf, bo, bg], axis=0)     # (4H,)
            return wx, wr, bb

        wx_f, wr_f, bb_f = _pack_dir(self.w_ih_f, self.w_hh_f, self.b_ih_f, self.b_hh_f)
        wx_b, wr_b, bb_b = _pack_dir(self.w_ih_b, self.w_hh_b, self.b_ih_b, self.b_hh_b)

        V = vocab_size
        # per-vocab input projections (bias folded in), gate order [i,f,o,g]
        proj_f = self.word_embeds @ wx_f.T + bb_f              # (V, 4H)
        proj_b = self.word_embeds @ wx_b.T + bb_b              # (V, 4H)
        # combined column layout: [i_f i_b | f_f f_b | o_f o_b | g_f g_b]
        z_v = jnp.zeros((V, 4, H), jnp.float32)
        self.xproj_f = jnp.stack([proj_f.reshape(V, 4, H), z_v], axis=2).reshape(V, 8 * H)
        self.xproj_b = jnp.stack([z_v, proj_b.reshape(V, 4, H)], axis=2).reshape(V, 8 * H)

        # block-diagonal recurrent weights: rows 0:H act on fwd h, rows H:2H on bwd h
        z_h = jnp.zeros((H, 4, H), jnp.float32)
        whh_f_row = jnp.stack([wr_f.T.reshape(H, 4, H), z_h], axis=2).reshape(H, 8 * H)
        whh_b_row = jnp.stack([z_h, wr_b.T.reshape(H, 4, H)], axis=2).reshape(H, 8 * H)
        self.whh_blk = jnp.concatenate([whh_f_row, whh_b_row], axis=0)   # (2H, 8H)

        self.wtag_T = self.w_tag.T                              # (2H, K)
        self.btag = self.b_tag.reshape(1, K)
        self.h0_flat = self.h0.reshape(1, 2 * H)                # [h_fwd | h_bwd]
        self.c0_flat = self.c0.reshape(1, 2 * H)

    def forward(self, sentence):
        T = int(sentence.shape[0])
        K = self.tagset_size
        H = self.hidden_dim // 2
        smem = pl.BlockSpec(memory_space=pltpu.MemorySpace.SMEM)
        vmem = pl.BlockSpec(memory_space=pltpu.MemorySpace.VMEM)
        kern = functools.partial(bilstm_crf_kernel,
                                 start_idx=self.tag_to_ix['<start>'],
                                 stop_idx=self.tag_to_ix['<stop>'])
        path_full, score = pl.pallas_call(
            kern,
            out_shape=(jax.ShapeDtypeStruct((T + 1, 1), jnp.int32),
                       jax.ShapeDtypeStruct((1, 1), jnp.float32)),
            in_specs=[smem] + [vmem] * 8,
            out_specs=(vmem, vmem),
            scratch_shapes=[pltpu.VMEM((T, 2 * H), jnp.float32),   # hidden seq
                            pltpu.VMEM((T, K), jnp.float32),       # emission feats
                            pltpu.VMEM((T, K), jnp.int32)],        # backpointers
        )(sentence.astype(jnp.int32), self.xproj_f, self.xproj_b, self.whh_blk,
          self.h0_flat, self.c0_flat, self.wtag_T, self.btag, self.transitions)

        start_tag = path_full[0, 0]       # mirrors the PyTorch `start` pop
        tag_seq = path_full[1:, 0]        # (T,) best path
        return score[0, 0], tag_seq, start_tag

    __call__ = forward


# ----------------------------------------------------------------------------
if __name__ == "__main__":
    key = jax.random.PRNGKey(0)
    k_model, k_data = jax.random.split(key)

    tag_to_ix = {'B-NAME': 0, 'I-NAME': 1, 'O': 2, '<start>': 3, '<stop>': 4}
    vocab_size = 20
    embedding_dim = 16
    hidden_dim = 32
    seq_len = 8

    model = BiLSTM_CRF(vocab_size, tag_to_ix, embedding_dim, hidden_dim, k_model)
    sentence = jax.random.randint(k_data, (seq_len,), 0, vocab_size, dtype=jnp.int32)

    score, tag_seq, start_tag = model(sentence)
    score = jax.block_until_ready(score)
    tag_seq = jax.block_until_ready(tag_seq)

    # mirrors the `assert start == tag_to_ix['<start>']` in the PyTorch module
    assert int(start_tag) == tag_to_ix['<start>']
    assert tag_seq.shape == (seq_len,)
    assert bool(jnp.isfinite(score))

    print("KERNEL_OK")
</pallas_src>

<mosaic_0001>
module attributes {stable_mosaic.version = 11 : i64} {
  func.func @bilstm_crf_kernel(%arg0: memref<8xi32, #tpu.memory_space<smem>>, %arg1: memref<20x128xf32, #tpu.memory_space<vmem>>, %arg2: memref<20x128xf32, #tpu.memory_space<vmem>>, %arg3: memref<32x128xf32, #tpu.memory_space<vmem>>, %arg4: memref<1x32xf32, #tpu.memory_space<vmem>>, %arg5: memref<1x32xf32, #tpu.memory_space<vmem>>, %arg6: memref<32x5xf32, #tpu.memory_space<vmem>>, %arg7: memref<1x5xf32, #tpu.memory_space<vmem>>, %arg8: memref<5x5xf32, #tpu.memory_space<vmem>>, %arg9: memref<9x1xi32, #tpu.memory_space<vmem>>, %arg10: memref<1x1xf32, #tpu.memory_space<vmem>>, %arg11: memref<8x32xf32, #tpu.memory_space<vmem>>, %arg12: memref<8x5xf32, #tpu.memory_space<vmem>>, %arg13: memref<8x5xi32, #tpu.memory_space<vmem>>) attributes {dimension_semantics = [], scalar_prefetch = 0 : i64, scratch_operands = 3 : i64, tpu.core_type = #tpu.core_type<tc>} {
    %c0 = arith.constant 0 : index
    %c0_0 = arith.constant 0 : index
    %0 = vector.load %arg3[%c0, %c0_0] : memref<32x128xf32, #tpu.memory_space<vmem>>, vector<32x128xf32>
    %c0_1 = arith.constant 0 : index
    %c0_2 = arith.constant 0 : index
    %1 = vector.load %arg4[%c0_1, %c0_2] : memref<1x32xf32, #tpu.memory_space<vmem>>, vector<1x32xf32>
    %c0_3 = arith.constant 0 : index
    %c0_4 = arith.constant 0 : index
    %2 = vector.load %arg5[%c0_3, %c0_4] : memref<1x32xf32, #tpu.memory_space<vmem>>, vector<1x32xf32>
    %c0_i32 = arith.constant 0 : i32
    %3 = arith.index_cast %c0_i32 : i32 to index
    %4 = memref.load %arg0[%3] : memref<8xi32, #tpu.memory_space<smem>>
    %5 = arith.index_cast %4 : i32 to index
    %c0_5 = arith.constant 0 : index
    %6 = vector.load %arg1[%5, %c0_5] : memref<20x128xf32, #tpu.memory_space<vmem>>, vector<1x128xf32>
    %c7_i32 = arith.constant 7 : i32
    %7 = arith.subi %c7_i32, %c0_i32 : i32
    %8 = arith.index_cast %7 : i32 to index
    %9 = memref.load %arg0[%8] : memref<8xi32, #tpu.memory_space<smem>>
    %10 = arith.index_cast %9 : i32 to index
    %c0_6 = arith.constant 0 : index
    %11 = vector.load %arg2[%10, %c0_6] : memref<20x128xf32, #tpu.memory_space<vmem>>, vector<1x128xf32>
    %12 = arith.addf %6, %11 : vector<1x128xf32>
    %cst = arith.constant dense<0.000000e+00> : vector<1x128xf32>
    %13 = tpu.matmul %1, %0, %cst {dimension_numbers = #tpu.dot_dimension_numbers<[1], [0], [0], [1], [0, 0, 1, 1], [], []>} : vector<1x32xf32>, vector<32x128xf32>, vector<1x128xf32> -> vector<1x128xf32>
    %14 = arith.addf %12, %13 : vector<1x128xf32>
    %15 = vector.extract_strided_slice %14 {offsets = [0, 0], sizes = [1, 96], strides = [1, 1]} : vector<1x128xf32> to vector<1x96xf32>
    %16 = arith.negf %15 : vector<1x96xf32>
    %17 = math.exp %16 : vector<1x96xf32>
    %cst_7 = arith.constant 1.000000e+00 : f32
    %18 = vector.broadcast %cst_7 : f32 to vector<1x96xf32>
    %19 = arith.addf %18, %17 : vector<1x96xf32>
    %20 = arith.divf %18, %19 : vector<1x96xf32>
    %21 = vector.extract_strided_slice %14 {offsets = [0, 96], sizes = [1, 32], strides = [1, 1]} : vector<1x128xf32> to vector<1x32xf32>
    %22 = math.tanh %21 : vector<1x32xf32>
    %23 = vector.extract_strided_slice %20 {offsets = [0, 0], sizes = [1, 32], strides = [1, 1]} : vector<1x96xf32> to vector<1x32xf32>
    %24 = vector.extract_strided_slice %20 {offsets = [0, 32], sizes = [1, 32], strides = [1, 1]} : vector<1x96xf32> to vector<1x32xf32>
    %25 = vector.extract_strided_slice %20 {offsets = [0, 64], sizes = [1, 32], strides = [1, 1]} : vector<1x96xf32> to vector<1x32xf32>
    %26 = arith.mulf %24, %2 : vector<1x32xf32>
    %27 = arith.mulf %23, %22 : vector<1x32xf32>
    %28 = arith.addf %26, %27 : vector<1x32xf32>
    %29 = math.tanh %28 : vector<1x32xf32>
    %30 = arith.mulf %25, %29 : vector<1x32xf32>
    %31 = vector.extract_strided_slice %30 {offsets = [0, 0], sizes = [1, 16], strides = [1, 1]} : vector<1x32xf32> to vector<1x16xf32>
    %32 = arith.index_cast %c0_i32 : i32 to index
    %c0_8 = arith.constant 0 : index
    %33 = vector.load %arg11[%32, %c0_8] : memref<8x32xf32, #tpu.memory_space<vmem>>, vector<1x16xf32>
    tpu.vector_store %arg11[%32, %c0_8], %31 {strides = array<i32>} : memref<8x32xf32, #tpu.memory_space<vmem>>, vector<1x16xf32>,
    %34 = vector.extract_strided_slice %30 {offsets = [0, 16], sizes = [1, 16], strides = [1, 1]} : vector<1x32xf32> to vector<1x16xf32>
    %c7_i32_9 = arith.constant 7 : i32
    %35 = arith.subi %c7_i32_9, %c0_i32 : i32
    %36 = arith.index_cast %35 : i32 to index
    %c16 = arith.constant 16 : index
    %37 = vector.load %arg11[%36, %c16] : memref<8x32xf32, #tpu.memory_space<vmem>>, vector<1x16xf32>
    tpu.vector_store %arg11[%36, %c16], %34 {strides = array<i32>} : memref<8x32xf32, #tpu.memory_space<vmem>>, vector<1x16xf32>,
    %c1_i32 = arith.constant 1 : i32
    %38 = arith.index_cast %c1_i32 : i32 to index
    %39 = memref.load %arg0[%38] : memref<8xi32, #tpu.memory_space<smem>>
    %40 = arith.index_cast %39 : i32 to index
    %c0_10 = arith.constant 0 : index
    %41 = vector.load %arg1[%40, %c0_10] : memref<20x128xf32, #tpu.memory_space<vmem>>, vector<1x128xf32>
    %c7_i32_11 = arith.constant 7 : i32
    %42 = arith.subi %c7_i32_11, %c1_i32 : i32
    %43 = arith.index_cast %42 : i32 to index
    %44 = memref.load %arg0[%43] : memref<8xi32, #tpu.memory_space<smem>>
    %45 = arith.index_cast %44 : i32 to index
    %c0_12 = arith.constant 0 : index
    %46 = vector.load %arg2[%45, %c0_12] : memref<20x128xf32, #tpu.memory_space<vmem>>, vector<1x128xf32>
    %47 = arith.addf %41, %46 : vector<1x128xf32>
    %cst_13 = arith.constant dense<0.000000e+00> : vector<1x128xf32>
    %48 = tpu.matmul %30, %0, %cst_13 {dimension_numbers = #tpu.dot_dimension_numbers<[1], [0], [0], [1], [0, 0, 1, 1], [], []>} : vector<1x32xf32>, vector<32x128xf32>, vector<1x128xf32> -> vector<1x128xf32>
    %49 = arith.addf %47, %48 : vector<1x128xf32>
    %50 = vector.extract_strided_slice %49 {offsets = [0, 0], sizes = [1, 96], strides = [1, 1]} : vector<1x128xf32> to vector<1x96xf32>
    %51 = arith.negf %50 : vector<1x96xf32>
    %52 = math.exp %51 : vector<1x96xf32>
    %cst_14 = arith.constant 1.000000e+00 : f32
    %53 = vector.broadcast %cst_14 : f32 to vector<1x96xf32>
    %54 = arith.addf %53, %52 : vector<1x96xf32>
    %55 = arith.divf %53, %54 : vector<1x96xf32>
    %56 = vector.extract_strided_slice %49 {offsets = [0, 96], sizes = [1, 32], strides = [1, 1]} : vector<1x128xf32> to vector<1x32xf32>
    %57 = math.tanh %56 : vector<1x32xf32>
    %58 = vector.extract_strided_slice %55 {offsets = [0, 0], sizes = [1, 32], strides = [1, 1]} : vector<1x96xf32> to vector<1x32xf32>
    %59 = vector.extract_strided_slice %55 {offsets = [0, 32], sizes = [1, 32], strides = [1, 1]} : vector<1x96xf32> to vector<1x32xf32>
    %60 = vector.extract_strided_slice %55 {offsets = [0, 64], sizes = [1, 32], strides = [1, 1]} : vector<1x96xf32> to vector<1x32xf32>
    %61 = arith.mulf %59, %28 : vector<1x32xf32>
    %62 = arith.mulf %58, %57 : vector<1x32xf32>
    %63 = arith.addf %61, %62 : vector<1x32xf32>
    %64 = math.tanh %63 : vector<1x32xf32>
    %65 = arith.mulf %60, %64 : vector<1x32xf32>
    %66 = vector.extract_strided_slice %65 {offsets = [0, 0], sizes = [1, 16], strides = [1, 1]} : vector<1x32xf32> to vector<1x16xf32>
    %67 = arith.index_cast %c1_i32 : i32 to index
    %c0_15 = arith.constant 0 : index
    %68 = vector.load %arg11[%67, %c0_15] : memref<8x32xf32, #tpu.memory_space<vmem>>, vector<1x16xf32>
    tpu.vector_store %arg11[%67, %c0_15], %66 {strides = array<i32>} : memref<8x32xf32, #tpu.memory_space<vmem>>, vector<1x16xf32>,
    %69 = vector.extract_strided_slice %65 {offsets = [0, 16], sizes = [1, 16], strides = [1, 1]} : vector<1x32xf32> to vector<1x16xf32>
    %c7_i32_16 = arith.constant 7 : i32
    %70 = arith.subi %c7_i32_16, %c1_i32 : i32
    %71 = arith.index_cast %70 : i32 to index
    %c16_17 = arith.constant 16 : index
    %72 = vector.load %arg11[%71, %c16_17] : memref<8x32xf32, #tpu.memory_space<vmem>>, vector<1x16xf32>
    tpu.vector_store %arg11[%71, %c16_17], %69 {strides = array<i32>} : memref<8x32xf32, #tpu.memory_space<vmem>>, vector<1x16xf32>,
    %c2_i32 = arith.constant 2 : i32
    %73 = arith.index_cast %c2_i32 : i32 to index
    %74 = memref.load %arg0[%73] : memref<8xi32, #tpu.memory_space<smem>>
    %75 = arith.index_cast %74 : i32 to index
    %c0_18 = arith.constant 0 : index
    %76 = vector.load %arg1[%75, %c0_18] : memref<20x128xf32, #tpu.memory_space<vmem>>, vector<1x128xf32>
    %c7_i32_19 = arith.constant 7 : i32
    %77 = arith.subi %c7_i32_19, %c2_i32 : i32
    %78 = arith.index_cast %77 : i32 to index
    %79 = memref.load %arg0[%78] : memref<8xi32, #tpu.memory_space<smem>>
    %80 = arith.index_cast %79 : i32 to index
    %c0_20 = arith.constant 0 : index
    %81 = vector.load %arg2[%80, %c0_20] : memref<20x128xf32, #tpu.memory_space<vmem>>, vector<1x128xf32>
    %82 = arith.addf %76, %81 : vector<1x128xf32>
    %cst_21 = arith.constant dense<0.000000e+00> : vector<1x128xf32>
    %83 = tpu.matmul %65, %0, %cst_21 {dimension_numbers = #tpu.dot_dimension_numbers<[1], [0], [0], [1], [0, 0, 1, 1], [], []>} : vector<1x32xf32>, vector<32x128xf32>, vector<1x128xf32> -> vector<1x128xf32>
    %84 = arith.addf %82, %83 : vector<1x128xf32>
    %85 = vector.extract_strided_slice %84 {offsets = [0, 0], sizes = [1, 96], strides = [1, 1]} : vector<1x128xf32> to vector<1x96xf32>
    %86 = arith.negf %85 : vector<1x96xf32>
    %87 = math.exp %86 : vector<1x96xf32>
    %cst_22 = arith.constant 1.000000e+00 : f32
    %88 = vector.broadcast %cst_22 : f32 to vector<1x96xf32>
    %89 = arith.addf %88, %87 : vector<1x96xf32>
    %90 = arith.divf %88, %89 : vector<1x96xf32>
    %91 = vector.extract_strided_slice %84 {offsets = [0, 96], sizes = [1, 32], strides = [1, 1]} : vector<1x128xf32> to vector<1x32xf32>
    %92 = math.tanh %91 : vector<1x32xf32>
    %93 = vector.extract_strided_slice %90 {offsets = [0, 0], sizes = [1, 32], strides = [1, 1]} : vector<1x96xf32> to vector<1x32xf32>
    %94 = vector.extract_strided_slice %90 {offsets = [0, 32], sizes = [1, 32], strides = [1, 1]} : vector<1x96xf32> to vector<1x32xf32>
    %95 = vector.extract_strided_slice %90 {offsets = [0, 64], sizes = [1, 32], strides = [1, 1]} : vector<1x96xf32> to vector<1x32xf32>
    %96 = arith.mulf %94, %63 : vector<1x32xf32>
    %97 = arith.mulf %93, %92 : vector<1x32xf32>
    %98 = arith.addf %96, %97 : vector<1x32xf32>
    %99 = math.tanh %98 : vector<1x32xf32>
    %100 = arith.mulf %95, %99 : vector<1x32xf32>
    %101 = vector.extract_strided_slice %100 {offsets = [0, 0], sizes = [1, 16], strides = [1, 1]} : vector<1x32xf32> to vector<1x16xf32>
    %102 = arith.index_cast %c2_i32 : i32 to index
    %c0_23 = arith.constant 0 : index
    %103 = vector.load %arg11[%102, %c0_23] : memref<8x32xf32, #tpu.memory_space<vmem>>, vector<1x16xf32>
    tpu.vector_store %arg11[%102, %c0_23], %101 {strides = array<i32>} : memref<8x32xf32, #tpu.memory_space<vmem>>, vector<1x16xf32>,
    %104 = vector.extract_strided_slice %100 {offsets = [0, 16], sizes = [1, 16], strides = [1, 1]} : vector<1x32xf32> to vector<1x16xf32>
    %c7_i32_24 = arith.constant 7 : i32
    %105 = arith.subi %c7_i32_24, %c2_i32 : i32
    %106 = arith.index_cast %105 : i32 to index
    %c16_25 = arith.constant 16 : index
    %107 = vector.load %arg11[%106, %c16_25] : memref<8x32xf32, #tpu.memory_space<vmem>>, vector<1x16xf32>
    tpu.vector_store %arg11[%106, %c16_25], %104 {strides = array<i32>} : memref<8x32xf32, #tpu.memory_space<vmem>>, vector<1x16xf32>,
    %c3_i32 = arith.constant 3 : i32
    %108 = arith.index_cast %c3_i32 : i32 to index
    %109 = memref.load %arg0[%108] : memref<8xi32, #tpu.memory_space<smem>>
    %110 = arith.index_cast %109 : i32 to index
    %c0_26 = arith.constant 0 : index
    %111 = vector.load %arg1[%110, %c0_26] : memref<20x128xf32, #tpu.memory_space<vmem>>, vector<1x128xf32>
    %c7_i32_27 = arith.constant 7 : i32
    %112 = arith.subi %c7_i32_27, %c3_i32 : i32
    %113 = arith.index_cast %112 : i32 to index
    %114 = memref.load %arg0[%113] : memref<8xi32, #tpu.memory_space<smem>>
    %115 = arith.index_cast %114 : i32 to index
    %c0_28 = arith.constant 0 : index
    %116 = vector.load %arg2[%115, %c0_28] : memref<20x128xf32, #tpu.memory_space<vmem>>, vector<1x128xf32>
    %117 = arith.addf %111, %116 : vector<1x128xf32>
    %cst_29 = arith.constant dense<0.000000e+00> : vector<1x128xf32>
    %118 = tpu.matmul %100, %0, %cst_29 {dimension_numbers = #tpu.dot_dimension_numbers<[1], [0], [0], [1], [0, 0, 1, 1], [], []>} : vector<1x32xf32>, vector<32x128xf32>, vector<1x128xf32> -> vector<1x128xf32>
    %119 = arith.addf %117, %118 : vector<1x128xf32>
    %120 = vector.extract_strided_slice %119 {offsets = [0, 0], sizes = [1, 96], strides = [1, 1]} : vector<1x128xf32> to vector<1x96xf32>
    %121 = arith.negf %120 : vector<1x96xf32>
    %122 = math.exp %121 : vector<1x96xf32>
    %cst_30 = arith.constant 1.000000e+00 : f32
    %123 = vector.broadcast %cst_30 : f32 to vector<1x96xf32>
    %124 = arith.addf %123, %122 : vector<1x96xf32>
    %125 = arith.divf %123, %124 : vector<1x96xf32>
    %126 = vector.extract_strided_slice %119 {offsets = [0, 96], sizes = [1, 32], strides = [1, 1]} : vector<1x128xf32> to vector<1x32xf32>
    %127 = math.tanh %126 : vector<1x32xf32>
    %128 = vector.extract_strided_slice %125 {offsets = [0, 0], sizes = [1, 32], strides = [1, 1]} : vector<1x96xf32> to vector<1x32xf32>
    %129 = vector.extract_strided_slice %125 {offsets = [0, 32], sizes = [1, 32], strides = [1, 1]} : vector<1x96xf32> to vector<1x32xf32>
    %130 = vector.extract_strided_slice %125 {offsets = [0, 64], sizes = [1, 32], strides = [1, 1]} : vector<1x96xf32> to vector<1x32xf32>
    %131 = arith.mulf %129, %98 : vector<1x32xf32>
    %132 = arith.mulf %128, %127 : vector<1x32xf32>
    %133 = arith.addf %131, %132 : vector<1x32xf32>
    %134 = math.tanh %133 : vector<1x32xf32>
    %135 = arith.mulf %130, %134 : vector<1x32xf32>
    %136 = vector.extract_strided_slice %135 {offsets = [0, 0], sizes = [1, 16], strides = [1, 1]} : vector<1x32xf32> to vector<1x16xf32>
    %137 = arith.index_cast %c3_i32 : i32 to index
    %c0_31 = arith.constant 0 : index
    %138 = vector.load %arg11[%137, %c0_31] : memref<8x32xf32, #tpu.memory_space<vmem>>, vector<1x16xf32>
    tpu.vector_store %arg11[%137, %c0_31], %136 {strides = array<i32>} : memref<8x32xf32, #tpu.memory_space<vmem>>, vector<1x16xf32>,
    %139 = vector.extract_strided_slice %135 {offsets = [0, 16], sizes = [1, 16], strides = [1, 1]} : vector<1x32xf32> to vector<1x16xf32>
    %c7_i32_32 = arith.constant 7 : i32
    %140 = arith.subi %c7_i32_32, %c3_i32 : i32
    %141 = arith.index_cast %140 : i32 to index
    %c16_33 = arith.constant 16 : index
    %142 = vector.load %arg11[%141, %c16_33] : memref<8x32xf32, #tpu.memory_space<vmem>>, vector<1x16xf32>
    tpu.vector_store %arg11[%141, %c16_33], %139 {strides = array<i32>} : memref<8x32xf32, #tpu.memory_space<vmem>>, vector<1x16xf32>,
    %c4_i32 = arith.constant 4 : i32
    %143 = arith.index_cast %c4_i32 : i32 to index
    %144 = memref.load %arg0[%143] : memref<8xi32, #tpu.memory_space<smem>>
    %145 = arith.index_cast %144 : i32 to index
    %c0_34 = arith.constant 0 : index
    %146 = vector.load %arg1[%145, %c0_34] : memref<20x128xf32, #tpu.memory_space<vmem>>, vector<1x128xf32>
    %c7_i32_35 = arith.constant 7 : i32
    %147 = arith.subi %c7_i32_35, %c4_i32 : i32
    %148 = arith.index_cast %147 : i32 to index
    %149 = memref.load %arg0[%148] : memref<8xi32, #tpu.memory_space<smem>>
    %150 = arith.index_cast %149 : i32 to index
    %c0_36 = arith.constant 0 : index
    %151 = vector.load %arg2[%150, %c0_36] : memref<20x128xf32, #tpu.memory_space<vmem>>, vector<1x128xf32>
    %152 = arith.addf %146, %151 : vector<1x128xf32>
    %cst_37 = arith.constant dense<0.000000e+00> : vector<1x128xf32>
    %153 = tpu.matmul %135, %0, %cst_37 {dimension_numbers = #tpu.dot_dimension_numbers<[1], [0], [0], [1], [0, 0, 1, 1], [], []>} : vector<1x32xf32>, vector<32x128xf32>, vector<1x128xf32> -> vector<1x128xf32>
    %154 = arith.addf %152, %153 : vector<1x128xf32>
    %155 = vector.extract_strided_slice %154 {offsets = [0, 0], sizes = [1, 96], strides = [1, 1]} : vector<1x128xf32> to vector<1x96xf32>
    %156 = arith.negf %155 : vector<1x96xf32>
    %157 = math.exp %156 : vector<1x96xf32>
    %cst_38 = arith.constant 1.000000e+00 : f32
    %158 = vector.broadcast %cst_38 : f32 to vector<1x96xf32>
    %159 = arith.addf %158, %157 : vector<1x96xf32>
    %160 = arith.divf %158, %159 : vector<1x96xf32>
    %161 = vector.extract_strided_slice %154 {offsets = [0, 96], sizes = [1, 32], strides = [1, 1]} : vector<1x128xf32> to vector<1x32xf32>
    %162 = math.tanh %161 : vector<1x32xf32>
    %163 = vector.extract_strided_slice %160 {offsets = [0, 0], sizes = [1, 32], strides = [1, 1]} : vector<1x96xf32> to vector<1x32xf32>
    %164 = vector.extract_strided_slice %160 {offsets = [0, 32], sizes = [1, 32], strides = [1, 1]} : vector<1x96xf32> to vector<1x32xf32>
    %165 = vector.extract_strided_slice %160 {offsets = [0, 64], sizes = [1, 32], strides = [1, 1]} : vector<1x96xf32> to vector<1x32xf32>
    %166 = arith.mulf %164, %133 : vector<1x32xf32>
    %167 = arith.mulf %163, %162 : vector<1x32xf32>
    %168 = arith.addf %166, %167 : vector<1x32xf32>
    %169 = math.tanh %168 : vector<1x32xf32>
    %170 = arith.mulf %165, %169 : vector<1x32xf32>
    %171 = vector.extract_strided_slice %170 {offsets = [0, 0], sizes = [1, 16], strides = [1, 1]} : vector<1x32xf32> to vector<1x16xf32>
    %172 = arith.index_cast %c4_i32 : i32 to index
    %c0_39 = arith.constant 0 : index
    %173 = vector.load %arg11[%172, %c0_39] : memref<8x32xf32, #tpu.memory_space<vmem>>, vector<1x16xf32>
    tpu.vector_store %arg11[%172, %c0_39], %171 {strides = array<i32>} : memref<8x32xf32, #tpu.memory_space<vmem>>, vector<1x16xf32>,
    %174 = vector.extract_strided_slice %170 {offsets = [0, 16], sizes = [1, 16], strides = [1, 1]} : vector<1x32xf32> to vector<1x16xf32>
    %c7_i32_40 = arith.constant 7 : i32
    %175 = arith.subi %c7_i32_40, %c4_i32 : i32
    %176 = arith.index_cast %175 : i32 to index
    %c16_41 = arith.constant 16 : index
    %177 = vector.load %arg11[%176, %c16_41] : memref<8x32xf32, #tpu.memory_space<vmem>>, vector<1x16xf32>
    tpu.vector_store %arg11[%176, %c16_41], %174 {strides = array<i32>} : memref<8x32xf32, #tpu.memory_space<vmem>>, vector<1x16xf32>,
    %c5_i32 = arith.constant 5 : i32
    %178 = arith.index_cast %c5_i32 : i32 to index
    %179 = memref.load %arg0[%178] : memref<8xi32, #tpu.memory_space<smem>>
    %180 = arith.index_cast %179 : i32 to index
    %c0_42 = arith.constant 0 : index
    %181 = vector.load %arg1[%180, %c0_42] : memref<20x128xf32, #tpu.memory_space<vmem>>, vector<1x128xf32>
    %c7_i32_43 = arith.constant 7 : i32
    %182 = arith.subi %c7_i32_43, %c5_i32 : i32
    %183 = arith.index_cast %182 : i32 to index
    %184 = memref.load %arg0[%183] : memref<8xi32, #tpu.memory_space<smem>>
    %185 = arith.index_cast %184 : i32 to index
    %c0_44 = arith.constant 0 : index
    %186 = vector.load %arg2[%185, %c0_44] : memref<20x128xf32, #tpu.memory_space<vmem>>, vector<1x128xf32>
    %187 = arith.addf %181, %186 : vector<1x128xf32>
    %cst_45 = arith.constant dense<0.000000e+00> : vector<1x128xf32>
    %188 = tpu.matmul %170, %0, %cst_45 {dimension_numbers = #tpu.dot_dimension_numbers<[1], [0], [0], [1], [0, 0, 1, 1], [], []>} : vector<1x32xf32>, vector<32x128xf32>, vector<1x128xf32> -> vector<1x128xf32>
    %189 = arith.addf %187, %188 : vector<1x128xf32>
    %190 = vector.extract_strided_slice %189 {offsets = [0, 0], sizes = [1, 96], strides = [1, 1]} : vector<1x128xf32> to vector<1x96xf32>
    %191 = arith.negf %190 : vector<1x96xf32>
    %192 = math.exp %191 : vector<1x96xf32>
    %cst_46 = arith.constant 1.000000e+00 : f32
    %193 = vector.broadcast %cst_46 : f32 to vector<1x96xf32>
    %194 = arith.addf %193, %192 : vector<1x96xf32>
    %195 = arith.divf %193, %194 : vector<1x96xf32>
    %196 = vector.extract_strided_slice %189 {offsets = [0, 96], sizes = [1, 32], strides = [1, 1]} : vector<1x128xf32> to vector<1x32xf32>
    %197 = math.tanh %196 : vector<1x32xf32>
    %198 = vector.extract_strided_slice %195 {offsets = [0, 0], sizes = [1, 32], strides = [1, 1]} : vector<1x96xf32> to vector<1x32xf32>
    %199 = vector.extract_strided_slice %195 {offsets = [0, 32], sizes = [1, 32], strides = [1, 1]} : vector<1x96xf32> to vector<1x32xf32>
    %200 = vector.extract_strided_slice %195 {offsets = [0, 64], sizes = [1, 32], strides = [1, 1]} : vector<1x96xf32> to vector<1x32xf32>
    %201 = arith.mulf %199, %168 : vector<1x32xf32>
    %202 = arith.mulf %198, %197 : vector<1x32xf32>
    %203 = arith.addf %201, %202 : vector<1x32xf32>
    %204 = math.tanh %203 : vector<1x32xf32>
    %205 = arith.mulf %200, %204 : vector<1x32xf32>
    %206 = vector.extract_strided_slice %205 {offsets = [0, 0], sizes = [1, 16], strides = [1, 1]} : vector<1x32xf32> to vector<1x16xf32>
    %207 = arith.index_cast %c5_i32 : i32 to index
    %c0_47 = arith.constant 0 : index
    %208 = vector.load %arg11[%207, %c0_47] : memref<8x32xf32, #tpu.memory_space<vmem>>, vector<1x16xf32>
    tpu.vector_store %arg11[%207, %c0_47], %206 {strides = array<i32>} : memref<8x32xf32, #tpu.memory_space<vmem>>, vector<1x16xf32>,
    %209 = vector.extract_strided_slice %205 {offsets = [0, 16], sizes = [1, 16], strides = [1, 1]} : vector<1x32xf32> to vector<1x16xf32>
    %c7_i32_48 = arith.constant 7 : i32
    %210 = arith.subi %c7_i32_48, %c5_i32 : i32
    %211 = arith.index_cast %210 : i32 to index
    %c16_49 = arith.constant 16 : index
    %212 = vector.load %arg11[%211, %c16_49] : memref<8x32xf32, #tpu.memory_space<vmem>>, vector<1x16xf32>
    tpu.vector_store %arg11[%211, %c16_49], %209 {strides = array<i32>} : memref<8x32xf32, #tpu.memory_space<vmem>>, vector<1x16xf32>,
    %c6_i32 = arith.constant 6 : i32
    %213 = arith.index_cast %c6_i32 : i32 to index
    %214 = memref.load %arg0[%213] : memref<8xi32, #tpu.memory_space<smem>>
    %215 = arith.index_cast %214 : i32 to index
    %c0_50 = arith.constant 0 : index
    %216 = vector.load %arg1[%215, %c0_50] : memref<20x128xf32, #tpu.memory_space<vmem>>, vector<1x128xf32>
    %c7_i32_51 = arith.constant 7 : i32
    %217 = arith.subi %c7_i32_51, %c6_i32 : i32
    %218 = arith.index_cast %217 : i32 to index
    %219 = memref.load %arg0[%218] : memref<8xi32, #tpu.memory_space<smem>>
    %220 = arith.index_cast %219 : i32 to index
    %c0_52 = arith.constant 0 : index
    %221 = vector.load %arg2[%220, %c0_52] : memref<20x128xf32, #tpu.memory_space<vmem>>, vector<1x128xf32>
    %222 = arith.addf %216, %221 : vector<1x128xf32>
    %cst_53 = arith.constant dense<0.000000e+00> : vector<1x128xf32>
    %223 = tpu.matmul %205, %0, %cst_53 {dimension_numbers = #tpu.dot_dimension_numbers<[1], [0], [0], [1], [0, 0, 1, 1], [], []>} : vector<1x32xf32>, vector<32x128xf32>, vector<1x128xf32> -> vector<1x128xf32>
    %224 = arith.addf %222, %223 : vector<1x128xf32>
    %225 = vector.extract_strided_slice %224 {offsets = [0, 0], sizes = [1, 96], strides = [1, 1]} : vector<1x128xf32> to vector<1x96xf32>
    %226 = arith.negf %225 : vector<1x96xf32>
    %227 = math.exp %226 : vector<1x96xf32>
    %cst_54 = arith.constant 1.000000e+00 : f32
    %228 = vector.broadcast %cst_54 : f32 to vector<1x96xf32>
    %229 = arith.addf %228, %227 : vector<1x96xf32>
    %230 = arith.divf %228, %229 : vector<1x96xf32>
    %231 = vector.extract_strided_slice %224 {offsets = [0, 96], sizes = [1, 32], strides = [1, 1]} : vector<1x128xf32> to vector<1x32xf32>
    %232 = math.tanh %231 : vector<1x32xf32>
    %233 = vector.extract_strided_slice %230 {offsets = [0, 0], sizes = [1, 32], strides = [1, 1]} : vector<1x96xf32> to vector<1x32xf32>
    %234 = vector.extract_strided_slice %230 {offsets = [0, 32], sizes = [1, 32], strides = [1, 1]} : vector<1x96xf32> to vector<1x32xf32>
    %235 = vector.extract_strided_slice %230 {offsets = [0, 64], sizes = [1, 32], strides = [1, 1]} : vector<1x96xf32> to vector<1x32xf32>
    %236 = arith.mulf %234, %203 : vector<1x32xf32>
    %237 = arith.mulf %233, %232 : vector<1x32xf32>
    %238 = arith.addf %236, %237 : vector<1x32xf32>
    %239 = math.tanh %238 : vector<1x32xf32>
    %240 = arith.mulf %235, %239 : vector<1x32xf32>
    %241 = vector.extract_strided_slice %240 {offsets = [0, 0], sizes = [1, 16], strides = [1, 1]} : vector<1x32xf32> to vector<1x16xf32>
    %242 = arith.index_cast %c6_i32 : i32 to index
    %c0_55 = arith.constant 0 : index
    %243 = vector.load %arg11[%242, %c0_55] : memref<8x32xf32, #tpu.memory_space<vmem>>, vector<1x16xf32>
    tpu.vector_store %arg11[%242, %c0_55], %241 {strides = array<i32>} : memref<8x32xf32, #tpu.memory_space<vmem>>, vector<1x16xf32>,
    %244 = vector.extract_strided_slice %240 {offsets = [0, 16], sizes = [1, 16], strides = [1, 1]} : vector<1x32xf32> to vector<1x16xf32>
    %c7_i32_56 = arith.constant 7 : i32
    %245 = arith.subi %c7_i32_56, %c6_i32 : i32
    %246 = arith.index_cast %245 : i32 to index
    %c16_57 = arith.constant 16 : index
    %247 = vector.load %arg11[%246, %c16_57] : memref<8x32xf32, #tpu.memory_space<vmem>>, vector<1x16xf32>
    tpu.vector_store %arg11[%246, %c16_57], %244 {strides = array<i32>} : memref<8x32xf32, #tpu.memory_space<vmem>>, vector<1x16xf32>,
    %c7_i32_58 = arith.constant 7 : i32
    %248 = arith.index_cast %c7_i32_58 : i32 to index
    %249 = memref.load %arg0[%248] : memref<8xi32, #tpu.memory_space<smem>>
    %250 = arith.index_cast %249 : i32 to index
    %c0_59 = arith.constant 0 : index
    %251 = vector.load %arg1[%250, %c0_59] : memref<20x128xf32, #tpu.memory_space<vmem>>, vector<1x128xf32>
    %c7_i32_60 = arith.constant 7 : i32
    %252 = arith.subi %c7_i32_60, %c7_i32_58 : i32
    %253 = arith.index_cast %252 : i32 to index
    %254 = memref.load %arg0[%253] : memref<8xi32, #tpu.memory_space<smem>>
    %255 = arith.index_cast %254 : i32 to index
    %c0_61 = arith.constant 0 : index
    %256 = vector.load %arg2[%255, %c0_61] : memref<20x128xf32, #tpu.memory_space<vmem>>, vector<1x128xf32>
    %257 = arith.addf %251, %256 : vector<1x128xf32>
    %cst_62 = arith.constant dense<0.000000e+00> : vector<1x128xf32>
    %258 = tpu.matmul %240, %0, %cst_62 {dimension_numbers = #tpu.dot_dimension_numbers<[1], [0], [0], [1], [0, 0, 1, 1], [], []>} : vector<1x32xf32>, vector<32x128xf32>, vector<1x128xf32> -> vector<1x128xf32>
    %259 = arith.addf %257, %258 : vector<1x128xf32>
    %260 = vector.extract_strided_slice %259 {offsets = [0, 0], sizes = [1, 96], strides = [1, 1]} : vector<1x128xf32> to vector<1x96xf32>
    %261 = arith.negf %260 : vector<1x96xf32>
    %262 = math.exp %261 : vector<1x96xf32>
    %cst_63 = arith.constant 1.000000e+00 : f32
    %263 = vector.broadcast %cst_63 : f32 to vector<1x96xf32>
    %264 = arith.addf %263, %262 : vector<1x96xf32>
    %265 = arith.divf %263, %264 : vector<1x96xf32>
    %266 = vector.extract_strided_slice %259 {offsets = [0, 96], sizes = [1, 32], strides = [1, 1]} : vector<1x128xf32> to vector<1x32xf32>
    %267 = math.tanh %266 : vector<1x32xf32>
    %268 = vector.extract_strided_slice %265 {offsets = [0, 0], sizes = [1, 32], strides = [1, 1]} : vector<1x96xf32> to vector<1x32xf32>
    %269 = vector.extract_strided_slice %265 {offsets = [0, 32], sizes = [1, 32], strides = [1, 1]} : vector<1x96xf32> to vector<1x32xf32>
    %270 = vector.extract_strided_slice %265 {offsets = [0, 64], sizes = [1, 32], strides = [1, 1]} : vector<1x96xf32> to vector<1x32xf32>
    %271 = arith.mulf %269, %238 : vector<1x32xf32>
    %272 = arith.mulf %268, %267 : vector<1x32xf32>
    %273 = arith.addf %271, %272 : vector<1x32xf32>
    %274 = math.tanh %273 : vector<1x32xf32>
    %275 = arith.mulf %270, %274 : vector<1x32xf32>
    %276 = vector.extract_strided_slice %275 {offsets = [0, 0], sizes = [1, 16], strides = [1, 1]} : vector<1x32xf32> to vector<1x16xf32>
    %277 = arith.index_cast %c7_i32_58 : i32 to index
    %c0_64 = arith.constant 0 : index
    %278 = vector.load %arg11[%277, %c0_64] : memref<8x32xf32, #tpu.memory_space<vmem>>, vector<1x16xf32>
    tpu.vector_store %arg11[%277, %c0_64], %276 {strides = array<i32>} : memref<8x32xf32, #tpu.memory_space<vmem>>, vector<1x16xf32>,
    %279 = vector.extract_strided_slice %275 {offsets = [0, 16], sizes = [1, 16], strides = [1, 1]} : vector<1x32xf32> to vector<1x16xf32>
    %c7_i32_65 = arith.constant 7 : i32
    %280 = arith.subi %c7_i32_65, %c7_i32_58 : i32
    %281 = arith.index_cast %280 : i32 to index
    %c16_66 = arith.constant 16 : index
    %282 = vector.load %arg11[%281, %c16_66] : memref<8x32xf32, #tpu.memory_space<vmem>>, vector<1x16xf32>
    tpu.vector_store %arg11[%281, %c16_66], %279 {strides = array<i32>} : memref<8x32xf32, #tpu.memory_space<vmem>>, vector<1x16xf32>,
    %c8_i32 = arith.constant 8 : i32
    %c0_67 = arith.constant 0 : index
    %c0_68 = arith.constant 0 : index
    %283 = vector.load %arg11[%c0_67, %c0_68] : memref<8x32xf32, #tpu.memory_space<vmem>>, vector<8x32xf32>
    %c0_69 = arith.constant 0 : index
    %c0_70 = arith.constant 0 : index
    %284 = vector.load %arg6[%c0_69, %c0_70] : memref<32x5xf32, #tpu.memory_space<vmem>>, vector<32x5xf32>
    %cst_71 = arith.constant dense<0.000000e+00> : vector<8x5xf32>
    %285 = tpu.matmul %283, %284, %cst_71 {dimension_numbers = #tpu.dot_dimension_numbers<[1], [0], [0], [1], [0, 0, 1, 1], [], []>} : vector<8x32xf32>, vector<32x5xf32>, vector<8x5xf32> -> vector<8x5xf32>
    %c0_72 = arith.constant 0 : index
    %c0_73 = arith.constant 0 : index
    %286 = vector.load %arg7[%c0_72, %c0_73] : memref<1x5xf32, #tpu.memory_space<vmem>>, vector<1x5xf32>
    %287 = vector.broadcast %286 : vector<1x5xf32> to vector<8x5xf32>
    %288 = arith.addf %285, %287 : vector<8x5xf32>
    %c0_74 = arith.constant 0 : index
    %c0_75 = arith.constant 0 : index
    %289 = vector.load %arg12[%c0_74, %c0_75] : memref<8x5xf32, #tpu.memory_space<vmem>>, vector<8x5xf32>
    tpu.vector_store %arg12[%c0_74, %c0_75], %288 {strides = array<i32>} : memref<8x5xf32, #tpu.memory_space<vmem>>, vector<8x5xf32>,
    %c0_76 = arith.constant 0 : index
    %c0_77 = arith.constant 0 : index
    %290 = vector.load %arg8[%c0_76, %c0_77] : memref<5x5xf32, #tpu.memory_space<vmem>>, vector<5x5xf32>
    %291 = tpu.iota {dimensions = array<i32: 1>} : vector<1x5xi32>
    %292 = tpu.iota {dimensions = array<i32: 0>} : vector<5x5xi32>
    %c3_i32_78 = arith.constant 3 : i32
    %293 = vector.broadcast %c3_i32_78 : i32 to vector<1x5xi32>
    %294 = arith.cmpi eq, %291, %293 : vector<1x5xi32>
    %cst_79 = arith.constant 0.000000e+00 : f32
    %cst_80 = arith.constant -1.000000e+04 : f32
    %295 = vector.broadcast %cst_79 : f32 to vector<1x5xf32>
    %296 = vector.broadcast %cst_80 : f32 to vector<1x5xf32>
    %297 = arith.select %294, %295, %296 : vector<1x5xi1>, vector<1x5xf32>
    %c0_i32_81 = arith.constant 0 : i32
    %298 = arith.index_cast %c0_i32_81 : i32 to index
    %c0_82 = arith.constant 0 : index
    %299 = vector.load %arg12[%298, %c0_82] : memref<8x5xf32, #tpu.memory_space<vmem>>, vector<1x5xf32>
    %300 = vector.broadcast %297 : vector<1x5xf32> to vector<5x5xf32>
    %301 = arith.addf %300, %290 : vector<5x5xf32>
    %302 = tpu.transpose %301, [1, 0] : vector<5x5xf32> -> vector<5x5xf32>
    %cst_83 = arith.constant dense<0xFF800000> : vector<5xf32>
    %303 = vector.multi_reduction <maximumf>, %302, %cst_83 [0] : vector<5x5xf32> to vector<5xf32>
    %304 = vector.shape_cast %303 : vector<5xf32> to vector<1x5xf32>
    %305 = vector.broadcast %304 : vector<1x5xf32> to vector<5x5xf32>
    %306 = arith.cmpf oeq, %302, %305 : vector<5x5xf32>
    %c5_i32_84 = arith.constant 5 : i32
    %307 = vector.broadcast %c5_i32_84 : i32 to vector<5x5xi32>
    %308 = arith.select %306, %292, %307 : vector<5x5xi1>, vector<5x5xi32>
    %cst_85 = arith.constant dense<2147483647> : vector<5xi32>
    %309 = vector.multi_reduction <minsi>, %308, %cst_85 [0] : vector<5x5xi32> to vector<5xi32>
    %310 = vector.shape_cast %309 : vector<5xi32> to vector<1x5xi32>
    %311 = arith.index_cast %c0_i32_81 : i32 to index
    %c0_86 = arith.constant 0 : index
    %312 = vector.load %arg13[%311, %c0_86] : memref<8x5xi32, #tpu.memory_space<vmem>>, vector<1x5xi32>
    tpu.vector_store %arg13[%311, %c0_86], %310 {strides = array<i32>} : memref<8x5xi32, #tpu.memory_space<vmem>>, vector<1x5xi32>,
    %313 = arith.addf %304, %299 : vector<1x5xf32>
    %c1_i32_87 = arith.constant 1 : i32
    %314 = arith.index_cast %c1_i32_87 : i32 to index
    %c0_88 = arith.constant 0 : index
    %315 = vector.load %arg12[%314, %c0_88] : memref<8x5xf32, #tpu.memory_space<vmem>>, vector<1x5xf32>
    %316 = vector.broadcast %313 : vector<1x5xf32> to vector<5x5xf32>
    %317 = arith.addf %316, %290 : vector<5x5xf32>
    %318 = tpu.transpose %317, [1, 0] : vector<5x5xf32> -> vector<5x5xf32>
    %cst_89 = arith.constant dense<0xFF800000> : vector<5xf32>
    %319 = vector.multi_reduction <maximumf>, %318, %cst_89 [0] : vector<5x5xf32> to vector<5xf32>
    %320 = vector.shape_cast %319 : vector<5xf32> to vector<1x5xf32>
    %321 = vector.broadcast %320 : vector<1x5xf32> to vector<5x5xf32>
    %322 = arith.cmpf oeq, %318, %321 : vector<5x5xf32>
    %c5_i32_90 = arith.constant 5 : i32
    %323 = vector.broadcast %c5_i32_90 : i32 to vector<5x5xi32>
    %324 = arith.select %322, %292, %323 : vector<5x5xi1>, vector<5x5xi32>
    %cst_91 = arith.constant dense<2147483647> : vector<5xi32>
    %325 = vector.multi_reduction <minsi>, %324, %cst_91 [0] : vector<5x5xi32> to vector<5xi32>
    %326 = vector.shape_cast %325 : vector<5xi32> to vector<1x5xi32>
    %327 = arith.index_cast %c1_i32_87 : i32 to index
    %c0_92 = arith.constant 0 : index
    %328 = vector.load %arg13[%327, %c0_92] : memref<8x5xi32, #tpu.memory_space<vmem>>, vector<1x5xi32>
    tpu.vector_store %arg13[%327, %c0_92], %326 {strides = array<i32>} : memref<8x5xi32, #tpu.memory_space<vmem>>, vector<1x5xi32>,
    %329 = arith.addf %320, %315 : vector<1x5xf32>
    %c2_i32_93 = arith.constant 2 : i32
    %330 = arith.index_cast %c2_i32_93 : i32 to index
    %c0_94 = arith.constant 0 : index
    %331 = vector.load %arg12[%330, %c0_94] : memref<8x5xf32, #tpu.memory_space<vmem>>, vector<1x5xf32>
    %332 = vector.broadcast %329 : vector<1x5xf32> to vector<5x5xf32>
    %333 = arith.addf %332, %290 : vector<5x5xf32>
    %334 = tpu.transpose %333, [1, 0] : vector<5x5xf32> -> vector<5x5xf32>
    %cst_95 = arith.constant dense<0xFF800000> : vector<5xf32>
    %335 = vector.multi_reduction <maximumf>, %334, %cst_95 [0] : vector<5x5xf32> to vector<5xf32>
    %336 = vector.shape_cast %335 : vector<5xf32> to vector<1x5xf32>
    %337 = vector.broadcast %336 : vector<1x5xf32> to vector<5x5xf32>
    %338 = arith.cmpf oeq, %334, %337 : vector<5x5xf32>
    %c5_i32_96 = arith.constant 5 : i32
    %339 = vector.broadcast %c5_i32_96 : i32 to vector<5x5xi32>
    %340 = arith.select %338, %292, %339 : vector<5x5xi1>, vector<5x5xi32>
    %cst_97 = arith.constant dense<2147483647> : vector<5xi32>
    %341 = vector.multi_reduction <minsi>, %340, %cst_97 [0] : vector<5x5xi32> to vector<5xi32>
    %342 = vector.shape_cast %341 : vector<5xi32> to vector<1x5xi32>
    %343 = arith.index_cast %c2_i32_93 : i32 to index
    %c0_98 = arith.constant 0 : index
    %344 = vector.load %arg13[%343, %c0_98] : memref<8x5xi32, #tpu.memory_space<vmem>>, vector<1x5xi32>
    tpu.vector_store %arg13[%343, %c0_98], %342 {strides = array<i32>} : memref<8x5xi32, #tpu.memory_space<vmem>>, vector<1x5xi32>,
    %345 = arith.addf %336, %331 : vector<1x5xf32>
    %c3_i32_99 = arith.constant 3 : i32
    %346 = arith.index_cast %c3_i32_99 : i32 to index
    %c0_100 = arith.constant 0 : index
    %347 = vector.load %arg12[%346, %c0_100] : memref<8x5xf32, #tpu.memory_space<vmem>>, vector<1x5xf32>
    %348 = vector.broadcast %345 : vector<1x5xf32> to vector<5x5xf32>
    %349 = arith.addf %348, %290 : vector<5x5xf32>
    %350 = tpu.transpose %349, [1, 0] : vector<5x5xf32> -> vector<5x5xf32>
    %cst_101 = arith.constant dense<0xFF800000> : vector<5xf32>
    %351 = vector.multi_reduction <maximumf>, %350, %cst_101 [0] : vector<5x5xf32> to vector<5xf32>
    %352 = vector.shape_cast %351 : vector<5xf32> to vector<1x5xf32>
    %353 = vector.broadcast %352 : vector<1x5xf32> to vector<5x5xf32>
    %354 = arith.cmpf oeq, %350, %353 : vector<5x5xf32>
    %c5_i32_102 = arith.constant 5 : i32
    %355 = vector.broadcast %c5_i32_102 : i32 to vector<5x5xi32>
    %356 = arith.select %354, %292, %355 : vector<5x5xi1>, vector<5x5xi32>
    %cst_103 = arith.constant dense<2147483647> : vector<5xi32>
    %357 = vector.multi_reduction <minsi>, %356, %cst_103 [0] : vector<5x5xi32> to vector<5xi32>
    %358 = vector.shape_cast %357 : vector<5xi32> to vector<1x5xi32>
    %359 = arith.index_cast %c3_i32_99 : i32 to index
    %c0_104 = arith.constant 0 : index
    %360 = vector.load %arg13[%359, %c0_104] : memref<8x5xi32, #tpu.memory_space<vmem>>, vector<1x5xi32>
    tpu.vector_store %arg13[%359, %c0_104], %358 {strides = array<i32>} : memref<8x5xi32, #tpu.memory_space<vmem>>, vector<1x5xi32>,
    %361 = arith.addf %352, %347 : vector<1x5xf32>
    %c4_i32_105 = arith.constant 4 : i32
    %362 = arith.index_cast %c4_i32_105 : i32 to index
    %c0_106 = arith.constant 0 : index
    %363 = vector.load %arg12[%362, %c0_106] : memref<8x5xf32, #tpu.memory_space<vmem>>, vector<1x5xf32>
    %364 = vector.broadcast %361 : vector<1x5xf32> to vector<5x5xf32>
    %365 = arith.addf %364, %290 : vector<5x5xf32>
    %366 = tpu.transpose %365, [1, 0] : vector<5x5xf32> -> vector<5x5xf32>
    %cst_107 = arith.constant dense<0xFF800000> : vector<5xf32>
    %367 = vector.multi_reduction <maximumf>, %366, %cst_107 [0] : vector<5x5xf32> to vector<5xf32>
    %368 = vector.shape_cast %367 : vector<5xf32> to vector<1x5xf32>
    %369 = vector.broadcast %368 : vector<1x5xf32> to vector<5x5xf32>
    %370 = arith.cmpf oeq, %366, %369 : vector<5x5xf32>
    %c5_i32_108 = arith.constant 5 : i32
    %371 = vector.broadcast %c5_i32_108 : i32 to vector<5x5xi32>
    %372 = arith.select %370, %292, %371 : vector<5x5xi1>, vector<5x5xi32>
    %cst_109 = arith.constant dense<2147483647> : vector<5xi32>
    %373 = vector.multi_reduction <minsi>, %372, %cst_109 [0] : vector<5x5xi32> to vector<5xi32>
    %374 = vector.shape_cast %373 : vector<5xi32> to vector<1x5xi32>
    %375 = arith.index_cast %c4_i32_105 : i32 to index
    %c0_110 = arith.constant 0 : index
    %376 = vector.load %arg13[%375, %c0_110] : memref<8x5xi32, #tpu.memory_space<vmem>>, vector<1x5xi32>
    tpu.vector_store %arg13[%375, %c0_110], %374 {strides = array<i32>} : memref<8x5xi32, #tpu.memory_space<vmem>>, vector<1x5xi32>,
    %377 = arith.addf %368, %363 : vector<1x5xf32>
    %c5_i32_111 = arith.constant 5 : i32
    %378 = arith.index_cast %c5_i32_111 : i32 to index
    %c0_112 = arith.constant 0 : index
    %379 = vector.load %arg12[%378, %c0_112] : memref<8x5xf32, #tpu.memory_space<vmem>>, vector<1x5xf32>
    %380 = vector.broadcast %377 : vector<1x5xf32> to vector<5x5xf32>
    %381 = arith.addf %380, %290 : vector<5x5xf32>
    %382 = tpu.transpose %381, [1, 0] : vector<5x5xf32> -> vector<5x5xf32>
    %cst_113 = arith.constant dense<0xFF800000> : vector<5xf32>
    %383 = vector.multi_reduction <maximumf>, %382, %cst_113 [0] : vector<5x5xf32> to vector<5xf32>
    %384 = vector.shape_cast %383 : vector<5xf32> to vector<1x5xf32>
    %385 = vector.broadcast %384 : vector<1x5xf32> to vector<5x5xf32>
    %386 = arith.cmpf oeq, %382, %385 : vector<5x5xf32>
    %c5_i32_114 = arith.constant 5 : i32
    %387 = vector.broadcast %c5_i32_114 : i32 to vector<5x5xi32>
    %388 = arith.select %386, %292, %387 : vector<5x5xi1>, vector<5x5xi32>
    %cst_115 = arith.constant dense<2147483647> : vector<5xi32>
    %389 = vector.multi_reduction <minsi>, %388, %cst_115 [0] : vector<5x5xi32> to vector<5xi32>
    %390 = vector.shape_cast %389 : vector<5xi32> to vector<1x5xi32>
    %391 = arith.index_cast %c5_i32_111 : i32 to index
    %c0_116 = arith.constant 0 : index
    %392 = vector.load %arg13[%391, %c0_116] : memref<8x5xi32, #tpu.memory_space<vmem>>, vector<1x5xi32>
    tpu.vector_store %arg13[%391, %c0_116], %390 {strides = array<i32>} : memref<8x5xi32, #tpu.memory_space<vmem>>, vector<1x5xi32>,
    %393 = arith.addf %384, %379 : vector<1x5xf32>
    %c6_i32_117 = arith.constant 6 : i32
    %394 = arith.index_cast %c6_i32_117 : i32 to index
    %c0_118 = arith.constant 0 : index
    %395 = vector.load %arg12[%394, %c0_118] : memref<8x5xf32, #tpu.memory_space<vmem>>, vector<1x5xf32>
    %396 = vector.broadcast %393 : vector<1x5xf32> to vector<5x5xf32>
    %397 = arith.addf %396, %290 : vector<5x5xf32>
    %398 = tpu.transpose %397, [1, 0] : vector<5x5xf32> -> vector<5x5xf32>
    %cst_119 = arith.constant dense<0xFF800000> : vector<5xf32>
    %399 = vector.multi_reduction <maximumf>, %398, %cst_119 [0] : vector<5x5xf32> to vector<5xf32>
    %400 = vector.shape_cast %399 : vector<5xf32> to vector<1x5xf32>
    %401 = vector.broadcast %400 : vector<1x5xf32> to vector<5x5xf32>
    %402 = arith.cmpf oeq, %398, %401 : vector<5x5xf32>
    %c5_i32_120 = arith.constant 5 : i32
    %403 = vector.broadcast %c5_i32_120 : i32 to vector<5x5xi32>
    %404 = arith.select %402, %292, %403 : vector<5x5xi1>, vector<5x5xi32>
    %cst_121 = arith.constant dense<2147483647> : vector<5xi32>
    %405 = vector.multi_reduction <minsi>, %404, %cst_121 [0] : vector<5x5xi32> to vector<5xi32>
    %406 = vector.shape_cast %405 : vector<5xi32> to vector<1x5xi32>
    %407 = arith.index_cast %c6_i32_117 : i32 to index
    %c0_122 = arith.constant 0 : index
    %408 = vector.load %arg13[%407, %c0_122] : memref<8x5xi32, #tpu.memory_space<vmem>>, vector<1x5xi32>
    tpu.vector_store %arg13[%407, %c0_122], %406 {strides = array<i32>} : memref<8x5xi32, #tpu.memory_space<vmem>>, vector<1x5xi32>,
    %409 = arith.addf %400, %395 : vector<1x5xf32>
    %c7_i32_123 = arith.constant 7 : i32
    %410 = arith.index_cast %c7_i32_123 : i32 to index
    %c0_124 = arith.constant 0 : index
    %411 = vector.load %arg12[%410, %c0_124] : memref<8x5xf32, #tpu.memory_space<vmem>>, vector<1x5xf32>
    %412 = vector.broadcast %409 : vector<1x5xf32> to vector<5x5xf32>
    %413 = arith.addf %412, %290 : vector<5x5xf32>
    %414 = tpu.transpose %413, [1, 0] : vector<5x5xf32> -> vector<5x5xf32>
    %cst_125 = arith.constant dense<0xFF800000> : vector<5xf32>
    %415 = vector.multi_reduction <maximumf>, %414, %cst_125 [0] : vector<5x5xf32> to vector<5xf32>
    %416 = vector.shape_cast %415 : vector<5xf32> to vector<1x5xf32>
    %417 = vector.broadcast %416 : vector<1x5xf32> to vector<5x5xf32>
    %418 = arith.cmpf oeq, %414, %417 : vector<5x5xf32>
    %c5_i32_126 = arith.constant 5 : i32
    %419 = vector.broadcast %c5_i32_126 : i32 to vector<5x5xi32>
    %420 = arith.select %418, %292, %419 : vector<5x5xi1>, vector<5x5xi32>
    %cst_127 = arith.constant dense<2147483647> : vector<5xi32>
    %421 = vector.multi_reduction <minsi>, %420, %cst_127 [0] : vector<5x5xi32> to vector<5xi32>
    %422 = vector.shape_cast %421 : vector<5xi32> to vector<1x5xi32>
    %423 = arith.index_cast %c7_i32_123 : i32 to index
    %c0_128 = arith.constant 0 : index
    %424 = vector.load %arg13[%423, %c0_128] : memref<8x5xi32, #tpu.memory_space<vmem>>, vector<1x5xi32>
    tpu.vector_store %arg13[%423, %c0_128], %422 {strides = array<i32>} : memref<8x5xi32, #tpu.memory_space<vmem>>, vector<1x5xi32>,
    %425 = arith.addf %416, %411 : vector<1x5xf32>
    %c8_i32_129 = arith.constant 8 : i32
    %426 = vector.extract_strided_slice %290 {offsets = [4, 0], sizes = [1, 5], strides = [1, 1]} : vector<5x5xf32> to vector<1x5xf32>
    %427 = arith.addf %425, %426 : vector<1x5xf32>
    %c4_i32_130 = arith.constant 4 : i32
    %428 = vector.broadcast %c4_i32_130 : i32 to vector<1x5xi32>
    %429 = arith.cmpi eq, %291, %428 : vector<1x5xi32>
    %c3_i32_131 = arith.constant 3 : i32
    %430 = vector.broadcast %c3_i32_131 : i32 to vector<1x5xi32>
    %431 = arith.cmpi eq, %291, %430 : vector<1x5xi32>
    %432 = arith.ori %429, %431 : vector<1x5xi1>
    %cst_132 = arith.constant -1.000000e+04 : f32
    %433 = vector.broadcast %cst_132 : f32 to vector<1x5xf32>
    %434 = arith.select %432, %433, %427 : vector<1x5xi1>, vector<1x5xf32>
    %cst_133 = arith.constant dense<0xFF800000> : vector<1xf32>
    %435 = vector.multi_reduction <maximumf>, %434, %cst_133 [1] : vector<1x5xf32> to vector<1xf32>
    %436 = vector.shape_cast %435 : vector<1xf32> to vector<1x1xf32>
    %437 = vector.broadcast %436 : vector<1x1xf32> to vector<1x5xf32>
    %438 = arith.cmpf oeq, %434, %437 : vector<1x5xf32>
    %c5_i32_134 = arith.constant 5 : i32
    %439 = vector.broadcast %c5_i32_134 : i32 to vector<1x5xi32>
    %440 = arith.select %438, %291, %439 : vector<1x5xi1>, vector<1x5xi32>
    %cst_135 = arith.constant dense<2147483647> : vector<1xi32>
    %441 = vector.multi_reduction <minsi>, %440, %cst_135 [1] : vector<1x5xi32> to vector<1xi32>
    %442 = vector.shape_cast %441 : vector<1xi32> to vector<1x1xi32>
    %c0_136 = arith.constant 0 : index
    %c0_137 = arith.constant 0 : index
    %443 = vector.load %arg10[%c0_136, %c0_137] : memref<1x1xf32, #tpu.memory_space<vmem>>, vector<1x1xf32>
    tpu.vector_store %arg10[%c0_136, %c0_137], %436 {strides = array<i32>} : memref<1x1xf32, #tpu.memory_space<vmem>>, vector<1x1xf32>,
    %c8 = arith.constant 8 : index
    %c0_138 = arith.constant 0 : index
    %444 = vector.load %arg9[%c8, %c0_138] : memref<9x1xi32, #tpu.memory_space<vmem>>, vector<1x1xi32>
    tpu.vector_store %arg9[%c8, %c0_138], %442 {strides = array<i32>} : memref<9x1xi32, #tpu.memory_space<vmem>>, vector<1x1xi32>,
    %c0_i32_139 = arith.constant 0 : i32
    %c7_i32_140 = arith.constant 7 : i32
    %445 = arith.subi %c7_i32_140, %c0_i32_139 : i32
    %446 = arith.index_cast %445 : i32 to index
    %c0_141 = arith.constant 0 : index
    %447 = vector.load %arg13[%446, %c0_141] : memref<8x5xi32, #tpu.memory_space<vmem>>, vector<1x5xi32>
    %448 = vector.broadcast %442 : vector<1x1xi32> to vector<1x5xi32>
    %449 = arith.cmpi eq, %291, %448 : vector<1x5xi32>
    %c0_i32_142 = arith.constant 0 : i32
    %450 = vector.broadcast %c0_i32_142 : i32 to vector<1x5xi32>
    %451 = arith.select %449, %447, %450 : vector<1x5xi1>, vector<1x5xi32>
    %cst_143 = arith.constant dense<-2147483648> : vector<1xi32>
    %452 = vector.multi_reduction <maxsi>, %451, %cst_143 [1] : vector<1x5xi32> to vector<1xi32>
    %453 = vector.shape_cast %452 : vector<1xi32> to vector<1x1xi32>
    %454 = arith.index_cast %445 : i32 to index
    %c0_144 = arith.constant 0 : index
    %455 = vector.load %arg9[%454, %c0_144] : memref<9x1xi32, #tpu.memory_space<vmem>>, vector<1x1xi32>
    tpu.vector_store %arg9[%454, %c0_144], %453 {strides = array<i32>} : memref<9x1xi32, #tpu.memory_space<vmem>>, vector<1x1xi32>,
    %c1_i32_145 = arith.constant 1 : i32
    %c7_i32_146 = arith.constant 7 : i32
    %456 = arith.subi %c7_i32_146, %c1_i32_145 : i32
    %457 = arith.index_cast %456 : i32 to index
    %c0_147 = arith.constant 0 : index
    %458 = vector.load %arg13[%457, %c0_147] : memref<8x5xi32, #tpu.memory_space<vmem>>, vector<1x5xi32>
    %459 = vector.broadcast %453 : vector<1x1xi32> to vector<1x5xi32>
    %460 = arith.cmpi eq, %291, %459 : vector<1x5xi32>
    %c0_i32_148 = arith.constant 0 : i32
    %461 = vector.broadcast %c0_i32_148 : i32 to vector<1x5xi32>
    %462 = arith.select %460, %458, %461 : vector<1x5xi1>, vector<1x5xi32>
    %cst_149 = arith.constant dense<-2147483648> : vector<1xi32>
    %463 = vector.multi_reduction <maxsi>, %462, %cst_149 [1] : vector<1x5xi32> to vector<1xi32>
    %464 = vector.shape_cast %463 : vector<1xi32> to vector<1x1xi32>
    %465 = arith.index_cast %456 : i32 to index
    %c0_150 = arith.constant 0 : index
    %466 = vector.load %arg9[%465, %c0_150] : memref<9x1xi32, #tpu.memory_space<vmem>>, vector<1x1xi32>
    tpu.vector_store %arg9[%465, %c0_150], %464 {strides = array<i32>} : memref<9x1xi32, #tpu.memory_space<vmem>>, vector<1x1xi32>,
    %c2_i32_151 = arith.constant 2 : i32
    %c7_i32_152 = arith.constant 7 : i32
    %467 = arith.subi %c7_i32_152, %c2_i32_151 : i32
    %468 = arith.index_cast %467 : i32 to index
    %c0_153 = arith.constant 0 : index
    %469 = vector.load %arg13[%468, %c0_153] : memref<8x5xi32, #tpu.memory_space<vmem>>, vector<1x5xi32>
    %470 = vector.broadcast %464 : vector<1x1xi32> to vector<1x5xi32>
    %471 = arith.cmpi eq, %291, %470 : vector<1x5xi32>
    %c0_i32_154 = arith.constant 0 : i32
    %472 = vector.broadcast %c0_i32_154 : i32 to vector<1x5xi32>
    %473 = arith.select %471, %469, %472 : vector<1x5xi1>, vector<1x5xi32>
    %cst_155 = arith.constant dense<-2147483648> : vector<1xi32>
    %474 = vector.multi_reduction <maxsi>, %473, %cst_155 [1] : vector<1x5xi32> to vector<1xi32>
    %475 = vector.shape_cast %474 : vector<1xi32> to vector<1x1xi32>
    %476 = arith.index_cast %467 : i32 to index
    %c0_156 = arith.constant 0 : index
    %477 = vector.load %arg9[%476, %c0_156] : memref<9x1xi32, #tpu.memory_space<vmem>>, vector<1x1xi32>
    tpu.vector_store %arg9[%476, %c0_156], %475 {strides = array<i32>} : memref<9x1xi32, #tpu.memory_space<vmem>>, vector<1x1xi32>,
    %c3_i32_157 = arith.constant 3 : i32
    %c7_i32_158 = arith.constant 7 : i32
    %478 = arith.subi %c7_i32_158, %c3_i32_157 : i32
    %479 = arith.index_cast %478 : i32 to index
    %c0_159 = arith.constant 0 : index
    %480 = vector.load %arg13[%479, %c0_159] : memref<8x5xi32, #tpu.memory_space<vmem>>, vector<1x5xi32>
    %481 = vector.broadcast %475 : vector<1x1xi32> to vector<1x5xi32>
    %482 = arith.cmpi eq, %291, %481 : vector<1x5xi32>
    %c0_i32_160 = arith.constant 0 : i32
    %483 = vector.broadcast %c0_i32_160 : i32 to vector<1x5xi32>
    %484 = arith.select %482, %480, %483 : vector<1x5xi1>, vector<1x5xi32>
    %cst_161 = arith.constant dense<-2147483648> : vector<1xi32>
    %485 = vector.multi_reduction <maxsi>, %484, %cst_161 [1] : vector<1x5xi32> to vector<1xi32>
    %486 = vector.shape_cast %485 : vector<1xi32> to vector<1x1xi32>
    %487 = arith.index_cast %478 : i32 to index
    %c0_162 = arith.constant 0 : index
    %488 = vector.load %arg9[%487, %c0_162] : memref<9x1xi32, #tpu.memory_space<vmem>>, vector<1x1xi32>
    tpu.vector_store %arg9[%487, %c0_162], %486 {strides = array<i32>} : memref<9x1xi32, #tpu.memory_space<vmem>>, vector<1x1xi32>,
    %c4_i32_163 = arith.constant 4 : i32
    %c7_i32_164 = arith.constant 7 : i32
    %489 = arith.subi %c7_i32_164, %c4_i32_163 : i32
    %490 = arith.index_cast %489 : i32 to index
    %c0_165 = arith.constant 0 : index
    %491 = vector.load %arg13[%490, %c0_165] : memref<8x5xi32, #tpu.memory_space<vmem>>, vector<1x5xi32>
    %492 = vector.broadcast %486 : vector<1x1xi32> to vector<1x5xi32>
    %493 = arith.cmpi eq, %291, %492 : vector<1x5xi32>
    %c0_i32_166 = arith.constant 0 : i32
    %494 = vector.broadcast %c0_i32_166 : i32 to vector<1x5xi32>
    %495 = arith.select %493, %491, %494 : vector<1x5xi1>, vector<1x5xi32>
    %cst_167 = arith.constant dense<-2147483648> : vector<1xi32>
    %496 = vector.multi_reduction <maxsi>, %495, %cst_167 [1] : vector<1x5xi32> to vector<1xi32>
    %497 = vector.shape_cast %496 : vector<1xi32> to vector<1x1xi32>
    %498 = arith.index_cast %489 : i32 to index
    %c0_168 = arith.constant 0 : index
    %499 = vector.load %arg9[%498, %c0_168] : memref<9x1xi32, #tpu.memory_space<vmem>>, vector<1x1xi32>
    tpu.vector_store %arg9[%498, %c0_168], %497 {strides = array<i32>} : memref<9x1xi32, #tpu.memory_space<vmem>>, vector<1x1xi32>,
    %c5_i32_169 = arith.constant 5 : i32
    %c7_i32_170 = arith.constant 7 : i32
    %500 = arith.subi %c7_i32_170, %c5_i32_169 : i32
    %501 = arith.index_cast %500 : i32 to index
    %c0_171 = arith.constant 0 : index
    %502 = vector.load %arg13[%501, %c0_171] : memref<8x5xi32, #tpu.memory_space<vmem>>, vector<1x5xi32>
    %503 = vector.broadcast %497 : vector<1x1xi32> to vector<1x5xi32>
    %504 = arith.cmpi eq, %291, %503 : vector<1x5xi32>
    %c0_i32_172 = arith.constant 0 : i32
    %505 = vector.broadcast %c0_i32_172 : i32 to vector<1x5xi32>
    %506 = arith.select %504, %502, %505 : vector<1x5xi1>, vector<1x5xi32>
    %cst_173 = arith.constant dense<-2147483648> : vector<1xi32>
    %507 = vector.multi_reduction <maxsi>, %506, %cst_173 [1] : vector<1x5xi32> to vector<1xi32>
    %508 = vector.shape_cast %507 : vector<1xi32> to vector<1x1xi32>
    %509 = arith.index_cast %500 : i32 to index
    %c0_174 = arith.constant 0 : index
    %510 = vector.load %arg9[%509, %c0_174] : memref<9x1xi32, #tpu.memory_space<vmem>>, vector<1x1xi32>
    tpu.vector_store %arg9[%509, %c0_174], %508 {strides = array<i32>} : memref<9x1xi32, #tpu.memory_space<vmem>>, vector<1x1xi32>,
    %c6_i32_175 = arith.constant 6 : i32
    %c7_i32_176 = arith.constant 7 : i32
    %511 = arith.subi %c7_i32_176, %c6_i32_175 : i32
    %512 = arith.index_cast %511 : i32 to index
    %c0_177 = arith.constant 0 : index
    %513 = vector.load %arg13[%512, %c0_177] : memref<8x5xi32, #tpu.memory_space<vmem>>, vector<1x5xi32>
    %514 = vector.broadcast %508 : vector<1x1xi32> to vector<1x5xi32>
    %515 = arith.cmpi eq, %291, %514 : vector<1x5xi32>
    %c0_i32_178 = arith.constant 0 : i32
    %516 = vector.broadcast %c0_i32_178 : i32 to vector<1x5xi32>
    %517 = arith.select %515, %513, %516 : vector<1x5xi1>, vector<1x5xi32>
    %cst_179 = arith.constant dense<-2147483648> : vector<1xi32>
    %518 = vector.multi_reduction <maxsi>, %517, %cst_179 [1] : vector<1x5xi32> to vector<1xi32>
    %519 = vector.shape_cast %518 : vector<1xi32> to vector<1x1xi32>
    %520 = arith.index_cast %511 : i32 to index
    %c0_180 = arith.constant 0 : index
    %521 = vector.load %arg9[%520, %c0_180] : memref<9x1xi32, #tpu.memory_space<vmem>>, vector<1x1xi32>
    tpu.vector_store %arg9[%520, %c0_180], %519 {strides = array<i32>} : memref<9x1xi32, #tpu.memory_space<vmem>>, vector<1x1xi32>,
    %c7_i32_181 = arith.constant 7 : i32
    %c7_i32_182 = arith.constant 7 : i32
    %522 = arith.subi %c7_i32_182, %c7_i32_181 : i32
    %523 = arith.index_cast %522 : i32 to index
    %c0_183 = arith.constant 0 : index
    %524 = vector.load %arg13[%523, %c0_183] : memref<8x5xi32, #tpu.memory_space<vmem>>, vector<1x5xi32>
    %525 = vector.broadcast %519 : vector<1x1xi32> to vector<1x5xi32>
    %526 = arith.cmpi eq, %291, %525 : vector<1x5xi32>
    %c0_i32_184 = arith.constant 0 : i32
    %527 = vector.broadcast %c0_i32_184 : i32 to vector<1x5xi32>
    %528 = arith.select %526, %524, %527 : vector<1x5xi1>, vector<1x5xi32>
    %cst_185 = arith.constant dense<-2147483648> : vector<1xi32>
    %529 = vector.multi_reduction <maxsi>, %528, %cst_185 [1] : vector<1x5xi32> to vector<1xi32>
    %530 = vector.shape_cast %529 : vector<1xi32> to vector<1x1xi32>
    %531 = arith.index_cast %522 : i32 to index
    %c0_186 = arith.constant 0 : index
    %532 = vector.load %arg9[%531, %c0_186] : memref<9x1xi32, #tpu.memory_space<vmem>>, vector<1x1xi32>
    tpu.vector_store %arg9[%531, %c0_186], %530 {strides = array<i32>} : memref<9x1xi32, #tpu.memory_space<vmem>>, vector<1x1xi32>,
    %c8_i32_187 = arith.constant 8 : i32
    return
  }
}

</mosaic_0001>

<bundles_post_ra>
// kernel: tpu_custom_call.1
= control target key start
LH: loop header
LB: loop body
LE: loop exit
PB: predicated region body
PF: predicated region fallthrough
CT: control target
= control target key end

     0   :  { %16 = vsyncpa [#allocation8], 0  ;;  %s2557_s0 = inlined_call_operand.vmem [shape: s32[8], index: 0, kind: input, shape index: {}]   ;;  %s2558_s1 = inlined_call_operand.hbm [shape: f32[20,128], index: 1, kind: input, shape index: {}]   ;;  %s2559_s2 = inlined_call_operand.hbm [shape: f32[20,128], index: 2, kind: input, shape index: {}]   ;;  %s2560_s3 = inlined_call_operand.vmem [shape: f32[32,128], index: 3, kind: input, shape index: {}]   ;;  %s2561_s4 = inlined_call_operand.vmem [shape: f32[1,32], index: 4, kind: input, shape index: {}]   ;;  %s2562_s5 = inlined_call_operand.vmem [shape: f32[1,32], index: 5, kind: input, shape index: {}]   ;;  %s2563_s6 = inlined_call_operand.vmem [shape: f32[32,5], index: 6, kind: input, shape index: {}]   ;;  %s2564_s7 = inlined_call_operand.vmem [shape: f32[1,5], index: 7, kind: input, shape index: {}]   ;;  %s2565_s8 = inlined_call_operand.vmem [shape: f32[5,5], index: 8, kind: input, shape index: {}]   ;;  %s2566_s9 = inlined_call_operand.vmem [shape: s32[9,1], index: 9, kind: output, shape index: {0}]   ;;  %s2567_s10 = inlined_call_operand.hbm [shape: f32[1,1], index: 10, kind: output, shape index: {1}]  }
   0x1   :  { %17 = vsyncpa [#allocation6], 0 }
   0x2   :  { %18 = vsyncpa [#allocation11], 0 }
   0x3   :  { %19 = vsyncpa [#allocation7], 0  ;;  %s26_s15 = sshll.u32 %s2557_s0, 4  ;;  %s27_s15 = int_to_ptr.vmem [resolvable:$true] %s26_s15 }
   0x4   :  { %s2064_s16 = scalar_lea.vmem %s27_s15, 16  ;;  %p2069_p1 = scmp.lt.s32.totalorder %s27_s15, %s27_s15 }
   0x5   :  { %p2065_p0 = scmp.ne.s32.totalorder %s27_s15, %s2064_s16  ;;  %p2070_p2 = scmp.lt.s32.totalorder %s2064_s16, %s2064_s16 }
   0x7   :  { %p2071_p3 = por %p2070_p2, %p2069_p1 }
   0x9   :  { %p2072_p4 = pnand %p2071_p3, %p2065_p0 }
   0xb   :  { %2075 = shalt.err (!%p2072_p4)
}
   0xc   :  { %s2150_s17 = smov [#allocation5]   ;;  %s2151_s18 = smov [#allocation9]  }
   0xd   :  { %29 = dma.vmem_to_smem %s27_s15, 16, %s2150_s17, [#allocation8]  }
   0xe   :  { %s35_s19 = sshll.u32 %s2151_s18, 4  ;;  %s2076_s22 = scalar_lea.hbm %s2558_s1, 384  ;;  %s36_s19 = int_to_ptr.vmem [resolvable:$true] %s35_s19 }
   0xf   :  { %p2077_p5 = scmp.ne.s32.totalorder %s2558_s1, %s2076_s22  ;;  %p2080_p6 = scmp.lt.u32.totalorder %s2076_s22, %s2558_s1 }
  0x11   :  { %p2082_p7 = pnand %p2080_p6, %p2077_p5 }
  0x13   :  { %2085 = shalt.err (!%p2082_p7)
}
  0x14   :  { %s2086_s26 = scalar_lea.vmem %s36_s19, 384  ;;  %p2091_p9 = scmp.lt.s32.totalorder %s36_s19, %s36_s19 }
  0x15   :  { %p2087_p8 = scmp.ne.s32.totalorder %s36_s19, %s2086_s26  ;;  %p2092_p10 = scmp.lt.s32.totalorder %s2086_s26, %s2086_s26 }
  0x17   :  { %p2093_p11 = por %p2092_p10, %p2091_p9 }
  0x19   :  { %p2094_p12 = pnand %p2093_p11, %p2087_p8 }
  0x1b   :  { %2097 = shalt.err (!%p2094_p12)
}
  0x1c   :  { %s2152_s27 = smov 128   ;;  %s2153_s28 = smov 8  }
  0x1d   :  { %41 = dma.hbm_to_vmem [thread:$0]  %s2558_s1, 384, %s36_s19, [#allocation6], %s2152_s27, %s2152_s27, %s2153_s28  }
  0x1e   :  { %s2154_s11 = smov [#allocation10]   ;;  %s2098_s15 = scalar_lea.hbm %s2559_s2, 384 }
  0x1f   :  { %s47_s12 = sshll.u32 %s2154_s11, 4  ;;  %p2099_p13 = scmp.ne.s32.totalorder %s2559_s2, %s2098_s15  ;;  %s48_s12 = int_to_ptr.vmem [resolvable:$true] %s47_s12 }
  0x20   :  { %p2102_p0 = scmp.lt.u32.totalorder %s2098_s15, %s2559_s2 }
  0x22   :  { %p2104_p1 = pnand %p2102_p0, %p2099_p13 }
  0x24   :  { %2107 = shalt.err (!%p2104_p1)
}
  0x25   :  { %s2108_s21 = scalar_lea.vmem %s48_s12, 384  ;;  %p2113_p3 = scmp.lt.s32.totalorder %s48_s12, %s48_s12 }
  0x26   :  { %p2109_p2 = scmp.ne.s32.totalorder %s48_s12, %s2108_s21  ;;  %p2114_p4 = scmp.lt.s32.totalorder %s2108_s21, %s2108_s21 }
  0x28   :  { %p2115_p5 = por %p2114_p4, %p2113_p3 }
  0x2a   :  { %p2116_p6 = pnand %p2115_p5, %p2109_p2 }
  0x2c   :  { %2119 = shalt.err (!%p2116_p6)
}
  0x2d   :  { %53 = dma.hbm_to_vmem [thread:$0]  %s2559_s2, 384, %s48_s12, [#allocation11], %s2152_s27, %s2152_s27, %s2153_s28  }
  0x2e   :  { %2142 = dma.done.wait [#allocation8], 16  }
  0x2f   :  { %2143 = vsyncadd [#allocation8], 4294967280 }
  0x30   :  { %2144 = dma.done.wait [#allocation6], 384  }
  0x31   :  { %2145 = vsyncadd [#allocation6], 4294966912 }
  0x32   :  { %2146 = dma.done.wait [#allocation11], 384  }
  0x33   :  { %2147 = vsyncadd [#allocation11], 4294966912 }
  0x34   :  { %75 = sfence }
  0x35   :  { %v76_v0 = vld [vmem:[%s2560_s3] sm:$0xff]  ;;  %v77_v1 = vld [vmem:[%s2560_s3 + $0x8] sm:$0xff]  ;;  %v78_v2 = vld [vmem:[%s2560_s3 + $0x10] sm:$0xff]  ;;  %v2155_v3 = vmov 0.0|0.0   ;;  %vm2156_vm0 = vmmov 0   ;;  %v2157_v6 = vmov 0.0  }
  0x36   :  { %1934 = vmatprep.subr.bf16.mxu0 %v2155_v3  ;;  %v2254_v4 = vpack.c.bf16 %v77_v1, %v76_v0  ;;  %v79_v5 = vld [vmem:[%s2560_s3 + $0x18] sm:$0xff]  ;;  %1843 = vmatprep.mubr.msk.f32.mxu0 %vm2156_vm0, %v2157_v6  ;;  %v80_v8 = vld [vmem:[%s2561_s4] sm:$0x1]  ;;  %vm89_vm1 = vcmask 261120   ;;  %s2284_s4 = sld [smem:[#allocation5]]  ;;  %s2286_s29 = sld [smem:[#allocation5 + $0x7]] }
  0x37   :  { %1940 = vmatprep.subr.bf16.mxu1 %v2155_v3  ;;  %1854 = vmatprep.mubr.msk.f32.mxu1 %vm2156_vm0, %v2157_v6  ;;  %v2265_v7 = vpack.c.bf16 %v79_v5, %v78_v2  ;;  %s2158_s12 = smov 32   ;;  %v1760_v16 = vld [vmem:[%s2562_s5] ss:$0 sm:$0xff]  ;;  %s2159_s5 = smov 64   ;;  %vm200_vm2 = vcmask 122880   ;;  %vm202_vm3 = vcmask 254080  }
  0x38   :  { %1936 = vmatpush3.bf16.msra.mxu0 %v2254_v4  ;;  %1942 = vmatpush3.bf16.msra.mxu1 %v2254_v4  ;;  %s2307_s15 = sld [smem:[#allocation5 + $0x1]]  ;;  %s2309_s16 = sld [smem:[#allocation5 + $0x6]]  ;;  %vm1102_vm5 = vcmask 36864   ;;  %vm1122_vm9 = vcmask 32768   ;;  %vm1059_vm11 = vcmask 39936  }
  0x39   :  { %1937 = vmatprep.subr.bf16.mxu0 %v2155_v3  ;;  %1943 = vmatprep.subr.bf16.mxu1 %v2155_v3  ;;  %s2326_s20 = sld [smem:[#allocation5 + $0x2]]  ;;  %s2328_s21 = sld [smem:[#allocation5 + $0x5]] }
  0x3a   :  { %s2345_s22 = sld [smem:[#allocation5 + $0x3]]  ;;  %s2347_s23 = sld [smem:[#allocation5 + $0x4]] }
  0x3c   :  { %1939 = vmatpush3.bf16.msra.mxu0 %v2265_v7  ;;  %1945 = vmatpush3.bf16.msra.mxu1 %v2265_v7  ;;  %s83_s30 = scalar_lea.vmem [#allocation9], %s2284_s4  ;;  %s86_s11 = scalar_lea.vmem [#allocation10], %s2286_s29 }
  0x3d   :  { %1946 = vmatprep.subr.bf16.mxu0 %v2155_v3  ;;  %1952 = vmatprep.subr.bf16.mxu1 %v2155_v3  ;;  %v84_v9 = vld [vmem:[%s83_s30] sm:$0x1]  ;;  %s865_s30 = scalar_lea.vmem [#allocation9], %s2286_s29 }
  0x3e   :  { %v87_v10 = vld [vmem:[%s86_s11] sm:$0x1]  ;;  %s205_s17 = scalar_lea.vmem [#allocation9], %s2307_s15  ;;  %s208_s18 = scalar_lea.vmem [#allocation10], %s2309_s16 }
  0x3f   :  { %1844 = vmatmul.mubr.msk.f32.vlgmr.msra.gmra.mrb[0].mxu0 %vm89_vm1, %v80_v8  ;;  %v88_v11 = vadd.f32 %v87_v10, %v84_v9  ;;  %v206_v31 = vld [vmem:[%s205_s17] sm:$0x1]  ;;  %s315_s1 = scalar_lea.vmem [#allocation9], %s2326_s20  ;;  %s318_s19 = scalar_lea.vmem [#allocation10], %s2328_s21 }
  0x40   :  { %1948 = vmatpush3.bf16.msra.mxu0 %v2254_v4  ;;  %1865 = vmatprep.mubr.msk.f32.mxu0 %vm2156_vm0, %v2157_v6  ;;  %v209_v32 = vld [vmem:[%s208_s18] sm:$0x1]  ;;  %s425_s24 = scalar_lea.vmem [#allocation9], %s2345_s22  ;;  %s428_s0 = scalar_lea.vmem [#allocation10], %s2347_s23 }
  0x41   :  { %1949 = vmatprep.subr.bf16.mxu0 %v2155_v3  ;;  %v210_v33 = vadd.f32 %v209_v32, %v206_v31  ;;  %v316_v51 = vld [vmem:[%s315_s1] sm:$0x1]  ;;  %s535_s25 = scalar_lea.vmem [#allocation9], %s2347_s23  ;;  %s538_s26 = scalar_lea.vmem [#allocation10], %s2345_s22 }
  0x42   :  { %v319_v52 = vld [vmem:[%s318_s19] sm:$0x1]  ;;  %s645_s2 = scalar_lea.vmem [#allocation9], %s2328_s21  ;;  %s648_s27 = scalar_lea.vmem [#allocation10], %s2326_s20 }
  0x43   :  { %v320_v53 = vadd.f32 %v319_v52, %v316_v51  ;;  %v536_v31 = vld [vmem:[%s535_s25] sm:$0x1]  ;;  %s755_s3 = scalar_lea.vmem [#allocation9], %s2309_s16  ;;  %s758_s28 = scalar_lea.vmem [#allocation10], %s2307_s15 }
  0x44   :  { %1951 = vmatpush3.bf16.msra.mxu0 %v2265_v7  ;;  %v539_v32 = vld [vmem:[%s538_s26] sm:$0x1]  ;;  %s868_s11 = scalar_lea.vmem [#allocation10], %s2284_s4 }
  0x45   :  { %1958 = vmatprep.subr.bf16.mxu0 %v2155_v3  ;;  %v646_v51 = vld [vmem:[%s645_s2] sm:$0x1] }
  0x46   :  { %v649_v52 = vld [vmem:[%s648_s27] sm:$0x1] }
 0x112   :  { %v159_v12 = vpop.f32.mrb[0].mxu0 }
 0x113   :  { %v163_v13 = vadd.f32 %v159_v12, %v88_v11  ;;  %v1845_v14 = vpop.f32.mrb[1].mxu0  ;;  %v426_v11 = vld [vmem:[%s425_s24] sm:$0x1] }
 0x114   :  { %v429_v12 = vld [vmem:[%s428_s0] sm:$0x1] }
 0x115   :  { %2000 = vtanh.f32 %v163_v13  ;;  %v1759_v17 = vmul.f32 -1.442695, %v163_v13  ;;  %v430_v13 = vadd.f32 %v429_v12, %v426_v11 }
 0x117   :  { %2002 = vpow2.f32 %v1759_v17 }
 0x11f   :  { %v2001_v15 = vpop.eup %2000 }
 0x120   :  { %181 = vrot.lane.b32.xlu0 %v2001_v15, %s2158_s12 }
 0x121   :  { %v2003_v18 = vpop.eup %2002 }
 0x122   :  { %v167_v19 = vadd.f32 1.0, %v2003_v18 }
 0x124   :  { %176 = vrot.lane.b32.xlu0 %v1760_v16, %s2158_s12  ;;  %2004 = vrcp.f32 %v167_v19 }
 0x12e   :  { %v2005_v20 = vpop.eup %2004 }
 0x192   :  { %v182_v21 = vpop.permute.xlu0 %181 }
 0x193   :  { %v184_v22 = vmul.f32 %v2005_v20, %v182_v21 }
 0x195   :  { %186 = vrot.lane.b32.xlu1 %v184_v22, %s2158_s12 }
 0x196   :  { %v177_v23 = vpop.permute.xlu0 %176 }
 0x197   :  { %v179_v24 = vmul.f32 %v2005_v20, %v177_v23 }
 0x207   :  { %v187_v25 = vpop.permute.xlu1 %186 }
 0x208   :  { %v189_v26 = vadd.f32 %v187_v25, %v179_v24 }
 0x20a   :  { %2006 = vtanh.f32 %v189_v26 }
 0x214   :  { %v2007_v27 = vpop.eup %2006 }
 0x215   :  { %192 = vrot.lane.b32.xlu1 %v2007_v27, %s2158_s12 }
 0x287   :  { %v193_v28 = vpop.permute.xlu1 %192 }
 0x288   :  { %v195_v29 = vmul.f32 %v2005_v20, %v193_v28 }
 0x28a   :  { %197 = vrot.lane.b32.xlu0 %v195_v29, %s2159_s5 }
 0x2fc   :  { %v198_v30 = vpop.permute.xlu0 %197 }
 0x2fd   :  { %201 = vst.msk [vmem:[#allocation2] sm:$0x1] %vm200_vm2, %v198_v30  ;;  %1855 = vmatmul.mubr.msk.f32.vlgmr.msra.gmra.mrb[0].mxu1 %vm89_vm1, %v198_v30 }
 0x2fe   :  { %203 = vst.msk [vmem:[#allocation2 + $0x7] sm:$0x1] %vm202_vm3, %v198_v30  ;;  %1954 = vmatpush3.bf16.msra.mxu1 %v2254_v4  ;;  %1876 = vmatprep.mubr.msk.f32.mxu1 %vm2156_vm0, %v2157_v6 }
 0x2ff   :  { %1955 = vmatprep.subr.bf16.mxu1 %v2155_v3 }
 0x302   :  { %1957 = vmatpush3.bf16.msra.mxu1 %v2265_v7 }
 0x303   :  { %1964 = vmatprep.subr.bf16.mxu1 %v2155_v3 }
 0x3d0   :  { %v279_v34 = vpop.f32.mrb[0].mxu1 }
 0x3d1   :  { %v283_v35 = vadd.f32 %v279_v34, %v210_v33  ;;  %v1856_v36 = vpop.f32.mrb[1].mxu1  ;;  %v540_v33 = vadd.f32 %v539_v32, %v536_v31 }
 0x3d3   :  { %2008 = vtanh.f32 %v283_v35  ;;  %v1764_v38 = vmul.f32 -1.442695, %v283_v35 }
 0x3d5   :  { %2010 = vpow2.f32 %v1764_v38 }
 0x3dd   :  { %v2009_v37 = vpop.eup %2008 }
 0x3de   :  { %293 = vrot.lane.b32.xlu1 %v2009_v37, %s2158_s12 }
 0x3df   :  { %v2011_v39 = vpop.eup %2010 }
 0x3e0   :  { %v287_v40 = vadd.f32 1.0, %v2011_v39 }
 0x3e2   :  { %2012 = vrcp.f32 %v287_v40 }
 0x3ec   :  { %v2013_v41 = vpop.eup %2012 }
 0x3ed   :  { %v291_v44 = vmul.f32 %v2013_v41, %v189_v26 }
 0x450   :  { %v294_v42 = vpop.permute.xlu1 %293 }
 0x451   :  { %v296_v43 = vmul.f32 %v2013_v41, %v294_v42 }
 0x453   :  { %298 = vrot.lane.b32.xlu0 %v296_v43, %s2158_s12 }
 0x4c5   :  { %v299_v45 = vpop.permute.xlu0 %298 }
 0x4c6   :  { %v301_v46 = vadd.f32 %v299_v45, %v291_v44 }
 0x4c8   :  { %2014 = vtanh.f32 %v301_v46 }
 0x4d2   :  { %v2015_v47 = vpop.eup %2014 }
 0x4d3   :  { %304 = vrot.lane.b32.xlu1 %v2015_v47, %s2158_s12 }
 0x545   :  { %v305_v48 = vpop.permute.xlu1 %304 }
 0x546   :  { %v307_v49 = vmul.f32 %v2013_v41, %v305_v48 }
 0x548   :  { %309 = vrot.lane.b32.xlu0 %v307_v49, %s2159_s5 }
 0x5ba   :  { %v310_v50 = vpop.permute.xlu0 %309 }
 0x5bb   :  { %312 = vst.msk [vmem:[#allocation2 + $0x1] sm:$0x1] %vm200_vm2, %v310_v50  ;;  %1866 = vmatmul.mubr.msk.f32.vlgmr.msra.gmra.mrb[2].mxu0 %vm89_vm1, %v310_v50 }
 0x5bc   :  { %313 = vst.msk [vmem:[#allocation2 + $0x6] sm:$0x1] %vm202_vm3, %v310_v50  ;;  %1960 = vmatpush3.bf16.msra.mxu0 %v2254_v4  ;;  %1887 = vmatprep.mubr.msk.f32.mxu0 %vm2156_vm0, %v2157_v6 }
 0x5bd   :  { %1961 = vmatprep.subr.bf16.mxu0 %v2155_v3 }
 0x5c0   :  { %1963 = vmatpush3.bf16.msra.mxu0 %v2265_v7 }
 0x5c1   :  { %1970 = vmatprep.subr.bf16.mxu0 %v2155_v3 }
 0x68e   :  { %v389_v54 = vpop.f32.mrb[2].mxu0 }
 0x68f   :  { %v393_v55 = vadd.f32 %v389_v54, %v320_v53  ;;  %v1867_v56 = vpop.f32.mrb[3].mxu0  ;;  %v650_v53 = vadd.f32 %v649_v52, %v646_v51  ;;  %v1062_v51 = vlaneseq }
 0x691   :  { %2016 = vtanh.f32 %v393_v55  ;;  %v1768_v58 = vmul.f32 -1.442695, %v393_v55 }
 0x693   :  { %2018 = vpow2.f32 %v1768_v58 }
 0x69b   :  { %v2017_v57 = vpop.eup %2016 }
 0x69c   :  { %403 = vrot.lane.b32.xlu1 %v2017_v57, %s2158_s12 }
 0x69d   :  { %v2019_v59 = vpop.eup %2018 }
 0x69e   :  { %v397_v60 = vadd.f32 1.0, %v2019_v59 }
 0x6a0   :  { %2020 = vrcp.f32 %v397_v60 }
 0x6aa   :  { %v2021_v61 = vpop.eup %2020 }
 0x6ab   :  { %v401_v0 = vmul.f32 %v2021_v61, %v301_v46 }
 0x70e   :  { %v404_v62 = vpop.permute.xlu1 %403 }
 0x70f   :  { %v406_v63 = vmul.f32 %v2021_v61, %v404_v62 }
 0x711   :  { %408 = vrot.lane.b32.xlu0 %v406_v63, %s2158_s12 }
 0x783   :  { %v409_v1 = vpop.permute.xlu0 %408 }
 0x784   :  { %v411_v2 = vadd.f32 %v409_v1, %v401_v0 }
 0x786   :  { %2022 = vtanh.f32 %v411_v2 }
 0x790   :  { %v2023_v5 = vpop.eup %2022 }
 0x791   :  { %414 = vrot.lane.b32.xlu1 %v2023_v5, %s2158_s12 }
 0x803   :  { %v415_v8 = vpop.permute.xlu1 %414 }
 0x804   :  { %v417_v9 = vmul.f32 %v2021_v61, %v415_v8 }
 0x806   :  { %419 = vrot.lane.b32.xlu0 %v417_v9, %s2159_s5  ;;  %v756_v9 = vld [vmem:[%s755_s3] sm:$0x1] }
 0x878   :  { %v420_v10 = vpop.permute.xlu0 %419 }
 0x879   :  { %422 = vst.msk [vmem:[#allocation2 + $0x2] sm:$0x1] %vm200_vm2, %v420_v10  ;;  %1877 = vmatmul.mubr.msk.f32.vlgmr.msra.gmra.mrb[2].mxu1 %vm89_vm1, %v420_v10 }
 0x87a   :  { %423 = vst.msk [vmem:[#allocation2 + $0x5] sm:$0x1] %vm202_vm3, %v420_v10  ;;  %1966 = vmatpush3.bf16.msra.mxu1 %v2254_v4  ;;  %1898 = vmatprep.mubr.msk.f32.mxu1 %vm2156_vm0, %v2157_v6  ;;  %v759_v10 = vld [vmem:[%s758_s28] sm:$0x1] }
 0x87b   :  { %1967 = vmatprep.subr.bf16.mxu1 %v2155_v3  ;;  %v760_v11 = vadd.f32 %v759_v10, %v756_v9 }
 0x87e   :  { %1969 = vmatpush3.bf16.msra.mxu1 %v2265_v7 }
 0x87f   :  { %1976 = vmatprep.subr.bf16.mxu1 %v2155_v3 }
 0x94c   :  { %v499_v14 = vpop.f32.mrb[2].mxu1 }
 0x94d   :  { %v503_v15 = vadd.f32 %v499_v14, %v430_v13  ;;  %v1878_v16 = vpop.f32.mrb[3].mxu1 }
 0x94f   :  { %2024 = vtanh.f32 %v503_v15  ;;  %v1772_v18 = vmul.f32 -1.442695, %v503_v15 }
 0x951   :  { %2026 = vpow2.f32 %v1772_v18 }
 0x959   :  { %v2025_v17 = vpop.eup %2024 }
 0x95a   :  { %513 = vrot.lane.b32.xlu1 %v2025_v17, %s2158_s12 }
 0x95b   :  { %v2027_v19 = vpop.eup %2026 }
 0x95c   :  { %v507_v20 = vadd.f32 1.0, %v2027_v19 }
 0x95e   :  { %2028 = vrcp.f32 %v507_v20 }
 0x968   :  { %v2029_v21 = vpop.eup %2028 }
 0x969   :  { %v511_v24 = vmul.f32 %v2029_v21, %v411_v2 }
 0x9cc   :  { %v514_v22 = vpop.permute.xlu1 %513 }
 0x9cd   :  { %v516_v23 = vmul.f32 %v2029_v21, %v514_v22 }
 0x9cf   :  { %518 = vrot.lane.b32.xlu0 %v516_v23, %s2158_s12 }
 0xa41   :  { %v519_v25 = vpop.permute.xlu0 %518 }
 0xa42   :  { %v521_v26 = vadd.f32 %v519_v25, %v511_v24 }
 0xa44   :  { %2030 = vtanh.f32 %v521_v26 }
 0xa4e   :  { %v2031_v27 = vpop.eup %2030 }
 0xa4f   :  { %524 = vrot.lane.b32.xlu1 %v2031_v27, %s2158_s12 }
 0xac1   :  { %v525_v28 = vpop.permute.xlu1 %524 }
 0xac2   :  { %v527_v29 = vmul.f32 %v2029_v21, %v525_v28  ;;  %v866_v28 = vld [vmem:[%s865_s30] sm:$0x1] }
 0xac4   :  { %529 = vrot.lane.b32.xlu0 %v527_v29, %s2159_s5  ;;  %v869_v29 = vld [vmem:[%s868_s11] sm:$0x1]  ;;  %s2161_s11 = smov [#allocation12]  }
 0xac5   :  { %s1728_s4 = sshll.u32 %s2161_s11, 4  ;;  %s1729_s4 = int_to_ptr.vmem [resolvable:$true] %s1728_s4 }
 0xac6   :  { %s2120_s29 = scalar_lea.vmem %s1729_s4, 16  ;;  %s2124_s13 = scalar_lea.vmem %s1729_s4, 32 }
 0xac7   :  { %p2121_p7 = scmp.ne.s32.totalorder %s1729_s4, %s2120_s29  ;;  %p2125_p8 = scmp.lt.s32.totalorder %s1729_s4, %s1729_s4 }
 0xac8   :  { %p2126_p9 = scmp.lt.s32.totalorder %s2124_s13, %s2120_s29 }
 0xaca   :  { %p2127_p10 = por %p2126_p9, %p2125_p8 }
 0xacc   :  { %p2128_p11 = pnand %p2127_p10, %p2121_p7 }
 0xb36   :  { %v530_v30 = vpop.permute.xlu0 %529 }
 0xb37   :  { %532 = vst.msk [vmem:[#allocation2 + $0x3] sm:$0x1] %vm200_vm2, %v530_v30  ;;  %1888 = vmatmul.mubr.msk.f32.vlgmr.msra.gmra.mrb[4].mxu0 %vm89_vm1, %v530_v30 }
 0xb38   :  { %533 = vst.msk [vmem:[#allocation2 + $0x4] sm:$0x1] %vm202_vm3, %v530_v30  ;;  %1972 = vmatpush3.bf16.msra.mxu0 %v2254_v4  ;;  %1909 = vmatprep.mubr.msk.f32.mxu0 %vm2156_vm0, %v2157_v6  ;;  %v870_v30 = vadd.f32 %v869_v29, %v866_v28 }
 0xb39   :  { %1973 = vmatprep.subr.bf16.mxu0 %v2155_v3 }
 0xb3c   :  { %1975 = vmatpush3.bf16.msra.mxu0 %v2265_v7 }
 0xb3d   :  { %1982 = vmatprep.subr.bf16.mxu0 %v2155_v3 }
 0xc0a   :  { %v609_v34 = vpop.f32.mrb[4].mxu0 }
 0xc0b   :  { %v613_v35 = vadd.f32 %v609_v34, %v540_v33  ;;  %v1889_v36 = vpop.f32.mrb[5].mxu0 }
 0xc0d   :  { %2032 = vtanh.f32 %v613_v35  ;;  %v1776_v38 = vmul.f32 -1.442695, %v613_v35 }
 0xc0f   :  { %2034 = vpow2.f32 %v1776_v38 }
 0xc17   :  { %v2033_v37 = vpop.eup %2032 }
 0xc18   :  { %623 = vrot.lane.b32.xlu1 %v2033_v37, %s2158_s12 }
 0xc19   :  { %v2035_v39 = vpop.eup %2034 }
 0xc1a   :  { %v617_v40 = vadd.f32 1.0, %v2035_v39 }
 0xc1c   :  { %2036 = vrcp.f32 %v617_v40 }
 0xc26   :  { %v2037_v41 = vpop.eup %2036 }
 0xc27   :  { %v621_v44 = vmul.f32 %v2037_v41, %v521_v26 }
 0xc8a   :  { %v624_v42 = vpop.permute.xlu1 %623 }
 0xc8b   :  { %v626_v43 = vmul.f32 %v2037_v41, %v624_v42 }
 0xc8d   :  { %628 = vrot.lane.b32.xlu0 %v626_v43, %s2158_s12 }
 0xcff   :  { %v629_v45 = vpop.permute.xlu0 %628 }
 0xd00   :  { %v631_v46 = vadd.f32 %v629_v45, %v621_v44  ;;  %v975_v45 = vld [vmem:[%s2563_s6] sm:$0xff] }
 0xd02   :  { %2038 = vtanh.f32 %v631_v46 }
 0xd0c   :  { %v2039_v47 = vpop.eup %2038 }
 0xd0d   :  { %634 = vrot.lane.b32.xlu1 %v2039_v47, %s2158_s12 }
 0xd7f   :  { %v635_v48 = vpop.permute.xlu1 %634 }
 0xd80   :  { %v637_v49 = vmul.f32 %v2037_v41, %v635_v48  ;;  %v977_v48 = vld [vmem:[%s2563_s6 + $0x10] sm:$0xff] }
 0xd82   :  { %639 = vrot.lane.b32.xlu0 %v637_v49, %s2159_s5  ;;  %v978_v49 = vld [vmem:[%s2563_s6 + $0x18] sm:$0xff] }
 0xdf4   :  { %v640_v50 = vpop.permute.xlu0 %639 }
 0xdf5   :  { %642 = vst.msk [vmem:[#allocation2 + $0x4] sm:$0x1] %vm200_vm2, %v640_v50  ;;  %1899 = vmatmul.mubr.msk.f32.vlgmr.msra.gmra.mrb[4].mxu1 %vm89_vm1, %v640_v50 }
 0xdf6   :  { %643 = vst.msk [vmem:[#allocation2 + $0x3] sm:$0x1] %vm202_vm3, %v640_v50  ;;  %1978 = vmatpush3.bf16.msra.mxu1 %v2254_v4  ;;  %1920 = vmatprep.mubr.msk.f32.mxu1 %vm2156_vm0, %v2157_v6  ;;  %v1986_v50 = vpack.c.bf16 %v978_v49, %v977_v48 }
 0xdf7   :  { %1979 = vmatprep.subr.bf16.mxu1 %v2155_v3 }
 0xdfa   :  { %1981 = vmatpush3.bf16.msra.mxu1 %v2265_v7 }
 0xec8   :  { %v719_v54 = vpop.f32.mrb[4].mxu1 }
 0xec9   :  { %v723_v55 = vadd.f32 %v719_v54, %v650_v53  ;;  %v1900_v56 = vpop.f32.mrb[5].mxu1  ;;  %v2416_v53 = vand.u32 127, %v1062_v51 }
 0xeca   :  { %v2160_v56 = vmov -10000.0  }
 0xecb   :  { %2040 = vtanh.f32 %v723_v55  ;;  %v1780_v4 = vmul.f32 -1.442695, %v723_v55  ;;  %v2421_v55 = vld [vmem:[%s2565_s8] sm:$0x1f]  ;;  %vm1066_vm4 = vcmp.eq.s32.totalorder %v2416_v53, 3 }
 0xecd   :  { %2042 = vpow2.f32 %v1780_v4 }
 0xed5   :  { %v2041_v57 = vpop.eup %2040 }
 0xed6   :  { %733 = vrot.lane.b32.xlu1 %v2041_v57, %s2158_s12  ;;  %v1067_v57 = vsel %vm1066_vm4, 0.0, %v2160_v56 }
 0xed7   :  { %v2043_v58 = vpop.eup %2042 }
 0xed8   :  { %v727_v59 = vadd.f32 1.0, %v2043_v58 }
 0xeda   :  { %2044 = vrcp.f32 %v727_v59 }
 0xee4   :  { %v2045_v60 = vpop.eup %2044 }
 0xee5   :  { %v731_v62 = vmul.f32 %v2045_v60, %v631_v46  ;;  %v976_v46 = vld [vmem:[%s2563_s6 + $0x8] sm:$0xff] }
 0xee6   :  { %v1983_v47 = vpack.c.bf16 %v976_v46, %v975_v45 }
 0xf48   :  { %v734_v61 = vpop.permute.xlu1 %733 }
 0xf49   :  { %v736_v7 = vmul.f32 %v2045_v60, %v734_v61 }
 0xf4b   :  { %738 = vrot.lane.b32.xlu0 %v736_v7, %s2158_s12 }
 0xfbd   :  { %v739_v63 = vpop.permute.xlu0 %738 }
 0xfbe   :  { %v741_v0 = vadd.f32 %v739_v63, %v731_v62 }
 0xfc0   :  { %2046 = vtanh.f32 %v741_v0 }
 0xfca   :  { %v2047_v1 = vpop.eup %2046 }
 0xfcb   :  { %744 = vrot.lane.b32.xlu1 %v2047_v1, %s2158_s12  ;;  %v2432_v1 = vshrl.u32 %v1062_v51, 7 }
0x103d   :  { %v745_v2 = vpop.permute.xlu1 %744 }
0x103e   :  { %v747_v5 = vmul.f32 %v2045_v60, %v745_v2 }
0x1040   :  { %749 = vrot.lane.b32.xlu0 %v747_v5, %s2159_s5 }
0x10b2   :  { %v750_v8 = vpop.permute.xlu0 %749 }
0x10b3   :  { %752 = vst.msk [vmem:[#allocation2 + $0x5] sm:$0x1] %vm200_vm2, %v750_v8  ;;  %1910 = vmatmul.mubr.msk.f32.vlgmr.msra.gmra.mrb[6].mxu0 %vm89_vm1, %v750_v8 }
0x10b4   :  { %753 = vst.msk [vmem:[#allocation2 + $0x2] sm:$0x1] %vm202_vm3, %v750_v8  ;;  %1931 = vmatprep.mubr.msk.f32.mxu0 %vm2156_vm0, %v2157_v6  ;;  %1984 = vmatpush3.bf16.msra.mxu0 %v1983_v47 }
0x10b5   :  { %1985 = vmatprep.subr.bf16.mxu0 %v2155_v3  ;;  %v1069_v3 = vadd.f32 %v1067_v57, %v2421_v55 }
0x10b8   :  { %1987 = vmatpush3.bf16.msra.mxu0 %v1986_v50 }
0x1186   :  { %v829_v12 = vpop.f32.mrb[6].mxu0 }
0x1187   :  { %v833_v13 = vadd.f32 %v829_v12, %v760_v11  ;;  %v1911_v14 = vpop.f32.mrb[7].mxu0 }
0x1189   :  { %2048 = vtanh.f32 %v833_v13  ;;  %v1784_v16 = vmul.f32 -1.442695, %v833_v13 }
0x118b   :  { %2050 = vpow2.f32 %v1784_v16 }
0x1193   :  { %v2049_v15 = vpop.eup %2048 }
0x1194   :  { %843 = vrot.lane.b32.xlu1 %v2049_v15, %s2158_s12  ;;  %v1788_v15 = vld [vmem:[%s2564_s7] ss:$0 sm:$0xff] }
0x1195   :  { %v2051_v17 = vpop.eup %2050 }
0x1196   :  { %v837_v18 = vadd.f32 1.0, %v2051_v17 }
0x1198   :  { %2052 = vrcp.f32 %v837_v18 }
0x11a2   :  { %v2053_v19 = vpop.eup %2052 }
0x11a3   :  { %v841_v21 = vmul.f32 %v2053_v19, %v741_v0 }
0x1206   :  { %v844_v20 = vpop.permute.xlu1 %843 }
0x1207   :  { %v846_v6 = vmul.f32 %v2053_v19, %v844_v20 }
0x1209   :  { %848 = vrot.lane.b32.xlu0 %v846_v6, %s2158_s12 }
0x127b   :  { %v849_v22 = vpop.permute.xlu0 %848 }
0x127c   :  { %v851_v23 = vadd.f32 %v849_v22, %v841_v21 }
0x127e   :  { %2054 = vtanh.f32 %v851_v23 }
0x1288   :  { %v2055_v24 = vpop.eup %2054 }
0x1289   :  { %854 = vrot.lane.b32.xlu1 %v2055_v24, %s2158_s12 }
0x12fb   :  { %v855_v25 = vpop.permute.xlu1 %854 }
0x12fc   :  { %v857_v26 = vmul.f32 %v2053_v19, %v855_v25  ;;  %v2441_v19 = vsub.s32 0, %v2432_v1 }
0x12fe   :  { %859 = vrot.lane.b32.xlu0 %v857_v26, %s2159_s5 }
0x1370   :  { %v860_v27 = vpop.permute.xlu0 %859 }
0x1371   :  { %862 = vst.msk [vmem:[#allocation2 + $0x6] sm:$0x1] %vm200_vm2, %v860_v27  ;;  %1921 = vmatmul.mubr.msk.f32.vlgmr.msra.gmra.mrb[6].mxu1 %vm89_vm1, %v860_v27 }
0x1372   :  { %863 = vst.msk [vmem:[#allocation2 + $0x1] sm:$0x1] %vm202_vm3, %v860_v27 }
0x1444   :  { %v939_v31 = vpop.f32.mrb[6].mxu1 }
0x1445   :  { %v943_v32 = vadd.f32 %v939_v31, %v870_v30  ;;  %v1922_v33 = vpop.f32.mrb[7].mxu1 }
0x1447   :  { %2056 = vtanh.f32 %v943_v32  ;;  %v1787_v35 = vmul.f32 -1.442695, %v943_v32 }
0x1449   :  { %2058 = vpow2.f32 %v1787_v35 }
0x1451   :  { %v2057_v34 = vpop.eup %2056 }
0x1452   :  { %953 = vrot.lane.b32.xlu1 %v2057_v34, %s2158_s12 }
0x1453   :  { %v2059_v36 = vpop.eup %2058 }
0x1454   :  { %v947_v37 = vadd.f32 1.0, %v2059_v36 }
0x1456   :  { %2060 = vrcp.f32 %v947_v37 }
0x1460   :  { %v2061_v38 = vpop.eup %2060 }
0x1461   :  { %v951_v41 = vmul.f32 %v2061_v38, %v851_v23 }
0x14c4   :  { %v954_v39 = vpop.permute.xlu1 %953 }
0x14c5   :  { %v956_v40 = vmul.f32 %v2061_v38, %v954_v39 }
0x14c7   :  { %958 = vrot.lane.b32.xlu0 %v956_v40, %s2158_s12 }
0x1539   :  { %v959_v42 = vpop.permute.xlu0 %958 }
0x153a   :  { %v961_v43 = vadd.f32 %v959_v42, %v951_v41 }
0x153c   :  { %2062 = vtanh.f32 %v961_v43 }
0x1546   :  { %v2063_v44 = vpop.eup %2062 }
0x1547   :  { %964 = vrot.lane.b32.xlu1 %v2063_v44, %s2158_s12 }
0x1570   :  { %1070 = vxpose.xlu1.b32.start.end [1/1] (short) (narrow) %v1069_v3, 8 }
0x15b9   :  { %v965_v52 = vpop.permute.xlu1 %964 }
0x15ba   :  { %v967_v54 = vmul.f32 %v2061_v38, %v965_v52 }
0x15bc   :  { %969 = vrot.lane.b32.xlu0 %v967_v54, %s2159_s5 }
0x15f0   :  { %v1086_v59 = vpop.trf.xlu1 }
0x15f1   :  { %v1103_v60 = vsel %vm1102_vm5, %v1086_v59, -inf }
0x15f2   :  { %v1104_v61 = vrot.slane %v1103_v60, 4 }
0x15f4   :  { %v1105_v7 = vmax.f32 %v1103_v60, %v1104_v61 }
0x15f6   :  { %v1106_v62 = vrot.slane %v1105_v7, 2 }
0x15f8   :  { %v1107_v63 = vmax.f32 %v1105_v7, %v1106_v62 }
0x15fa   :  { %v1108_v0 = vrot.slane %v1107_v63, 1 }
0x15fc   :  { %v1109_v2 = vmax.f32 %v1107_v63, %v1108_v0 }
0x15fe   :  { %vm1110_vm6 = vcmp.eq.f32.partialorder %v1086_v59, %v1109_v2 }
0x15ff   :  { %v1111_v5 = vsel %vm1110_vm6, %v2432_v1, 5 }
0x1600   :  { %v1112_v8 = vsel %vm1102_vm5, %v1111_v5, 2147483647 }
0x1601   :  { %v1113_v9 = vrot.slane %v1112_v8, 4 }
0x1603   :  { %vm1114_vm7 = vcmp.lt.s32.totalorder %v1112_v8, %v1113_v9 }
0x1604   :  { %v1115_v10 = vsel %vm1114_vm7, %v1112_v8, %v1113_v9 }
0x1605   :  { %v1116_v11 = vrot.slane %v1115_v10, 2 }
0x1607   :  { %vm1117_vm8 = vcmp.lt.s32.totalorder %v1115_v10, %v1116_v11 }
0x1608   :  { %v1118_v12 = vsel %vm1117_vm8, %v1115_v10, %v1116_v11 }
0x1609   :  { %v1119_v13 = vrot.slane %v1118_v12, 1 }
0x160b   :  { %vm1120_vm10 = vcmp.lt.s32.totalorder %v1118_v12, %v1119_v13 }
0x160c   :  { %v1121_v14 = vsel %vm1120_vm10, %v1118_v12, %v1119_v13 }
0x160d   :  { %1123 = vst.msk [vmem:[#allocation4] sm:$0x1] %vm1122_vm9, %v1121_v14 }
0x162e   :  { %v970_v4 = vpop.permute.xlu0 %969 }
0x162f   :  { %972 = vst.msk [vmem:[#allocation2 + $0x7] sm:$0x1] %vm200_vm2, %v970_v4 }
0x1630   :  { %973 = vst.msk [vmem:[#allocation2] sm:$0x1] %vm202_vm3, %v970_v4 }
0x1637   :  { %v974_v58 = vld [vmem:[#allocation2] sm:$0xff] }
0x1638   :  { %1932 = vmatmul.mubr.msk.f32.vlgmr.msra.gmra.mrb[8].mxu0 %vm89_vm1, %v974_v58 }
0x170b   :  { %v1055_v16 = vpop.f32.mrb[8].mxu0 }
0x170c   :  { %v1056_v17 = vadd.f32 %v1788_v15, %v1055_v16  ;;  %v1933_v18 = vpop.f32.mrb[9].mxu0 }
0x170e   :  { %1060 = vst.msk [vmem:[#allocation3] sm:$0xff] %vm1059_vm11, %v1056_v17 }
0x1715   :  { %v1068_v20 = vld [vmem:[#allocation3] sm:$0x1]  ;;  %v1125_v31 = vld [vmem:[#allocation3 + $0x1] sm:$0x1]  ;;  %v1184_v51 = vld [vmem:[#allocation3 + $0x2] sm:$0x1] }
0x1716   :  { %v1124_v6 = vadd.f32 %v1109_v2, %v1068_v20  ;;  %v1243_v11 = vld [vmem:[#allocation3 + $0x3] sm:$0x1] }
0x1718   :  { %v1129_v21 = vrot.slane %v1124_v6, %v2441_v19 }
0x171a   :  { %v1130_v22 = vadd.f32 %v1129_v21, %v2421_v55 }
0x171c   :  { %1131 = vxpose.xlu0.b32.start.end [1/1] (short) (narrow) %v1130_v22, 8 }
0x179c   :  { %v1147_v23 = vpop.trf.xlu0 }
0x179d   :  { %v1163_v24 = vsel %vm1102_vm5, %v1147_v23, -inf }
0x179e   :  { %v1164_v25 = vrot.slane %v1163_v24, 4 }
0x17a0   :  { %v1165_v26 = vmax.f32 %v1163_v24, %v1164_v25 }
0x17a2   :  { %v1166_v27 = vrot.slane %v1165_v26, 2 }
0x17a4   :  { %v1167_v28 = vmax.f32 %v1165_v26, %v1166_v27 }
0x17a6   :  { %v1168_v29 = vrot.slane %v1167_v28, 1 }
0x17a8   :  { %v1169_v30 = vmax.f32 %v1167_v28, %v1168_v29 }
0x17aa   :  { %vm1170_vm12 = vcmp.eq.f32.partialorder %v1147_v23, %v1169_v30  ;;  %v1183_v32 = vadd.f32 %v1169_v30, %v1125_v31  ;;  %v1302_v31 = vld [vmem:[#allocation3 + $0x4] sm:$0x1] }
0x17ab   :  { %v1171_v33 = vsel %vm1170_vm12, %v2432_v1, 5 }
0x17ac   :  { %v1172_v34 = vsel %vm1102_vm5, %v1171_v33, 2147483647  ;;  %v1188_v35 = vrot.slane %v1183_v32, %v2441_v19 }
0x17ad   :  { %v1173_v36 = vrot.slane %v1172_v34, 4 }
0x17ae   :  { %v1189_v37 = vadd.f32 %v1188_v35, %v2421_v55 }
0x17af   :  { %vm1174_vm13 = vcmp.lt.s32.totalorder %v1172_v34, %v1173_v36 }
0x17b0   :  { %v1175_v38 = vsel %vm1174_vm13, %v1172_v34, %v1173_v36  ;;  %1190 = vxpose.xlu0.b32.start.end [1/1] (short) (narrow) %v1189_v37, 8 }
0x17b1   :  { %v1176_v39 = vrot.slane %v1175_v38, 2 }
0x17b3   :  { %vm1177_vm14 = vcmp.lt.s32.totalorder %v1175_v38, %v1176_v39 }
0x17b4   :  { %v1178_v40 = vsel %vm1177_vm14, %v1175_v38, %v1176_v39 }
0x17b5   :  { %v1179_v41 = vrot.slane %v1178_v40, 1 }
0x17b7   :  { %vm1180_vm15 = vcmp.lt.s32.totalorder %v1178_v40, %v1179_v41 }
0x17b8   :  { %v1181_v42 = vsel %vm1180_vm15, %v1178_v40, %v1179_v41 }
0x17b9   :  { %1182 = vst.msk [vmem:[#allocation4 + $0x1] sm:$0x1] %vm1122_vm9, %v1181_v42 }
0x1830   :  { %v1206_v43 = vpop.trf.xlu0 }
0x1831   :  { %v1222_v44 = vsel %vm1102_vm5, %v1206_v43, -inf }
0x1832   :  { %v1223_v45 = vrot.slane %v1222_v44, 4 }
0x1834   :  { %v1224_v46 = vmax.f32 %v1222_v44, %v1223_v45 }
0x1836   :  { %v1225_v47 = vrot.slane %v1224_v46, 2 }
0x1838   :  { %v1226_v48 = vmax.f32 %v1224_v46, %v1225_v47 }
0x183a   :  { %v1227_v49 = vrot.slane %v1226_v48, 1 }
0x183c   :  { %v1228_v50 = vmax.f32 %v1226_v48, %v1227_v49 }
0x183e   :  { %vm1229_vm0 = vcmp.eq.f32.partialorder %v1206_v43, %v1228_v50  ;;  %v1242_v52 = vadd.f32 %v1228_v50, %v1184_v51  ;;  %v1361_v51 = vld [vmem:[#allocation3 + $0x5] sm:$0x1] }
0x183f   :  { %v1230_v54 = vsel %vm1229_vm0, %v2432_v1, 5 }
0x1840   :  { %v1231_v56 = vsel %vm1102_vm5, %v1230_v54, 2147483647  ;;  %v1247_v57 = vrot.slane %v1242_v52, %v2441_v19 }
0x1841   :  { %v1232_v3 = vrot.slane %v1231_v56, 4 }
0x1842   :  { %v1248_v4 = vadd.f32 %v1247_v57, %v2421_v55 }
0x1843   :  { %vm1233_vm1 = vcmp.lt.s32.totalorder %v1231_v56, %v1232_v3 }
0x1844   :  { %v1234_v58 = vsel %vm1233_vm1, %v1231_v56, %v1232_v3  ;;  %1249 = vxpose.xlu0.b32.start.end [1/1] (short) (narrow) %v1248_v4, 8 }
0x1845   :  { %v1235_v59 = vrot.slane %v1234_v58, 2 }
0x1847   :  { %vm1236_vm2 = vcmp.lt.s32.totalorder %v1234_v58, %v1235_v59 }
0x1848   :  { %v1237_v60 = vsel %vm1236_vm2, %v1234_v58, %v1235_v59 }
0x1849   :  { %v1238_v61 = vrot.slane %v1237_v60, 1 }
0x184b   :  { %vm1239_vm3 = vcmp.lt.s32.totalorder %v1237_v60, %v1238_v61 }
0x184c   :  { %v1240_v7 = vsel %vm1239_vm3, %v1237_v60, %v1238_v61 }
0x184d   :  { %1241 = vst.msk [vmem:[#allocation4 + $0x2] sm:$0x1] %vm1122_vm9, %v1240_v7 }
0x18c4   :  { %v1265_v62 = vpop.trf.xlu0 }
0x18c5   :  { %v1281_v63 = vsel %vm1102_vm5, %v1265_v62, -inf }
0x18c6   :  { %v1282_v0 = vrot.slane %v1281_v63, 4 }
0x18c8   :  { %v1283_v2 = vmax.f32 %v1281_v63, %v1282_v0 }
0x18ca   :  { %v1284_v5 = vrot.slane %v1283_v2, 2 }
0x18cc   :  { %v1285_v8 = vmax.f32 %v1283_v2, %v1284_v5 }
0x18ce   :  { %v1286_v9 = vrot.slane %v1285_v8, 1 }
0x18d0   :  { %v1287_v10 = vmax.f32 %v1285_v8, %v1286_v9 }
0x18d2   :  { %vm1288_vm6 = vcmp.eq.f32.partialorder %v1265_v62, %v1287_v10  ;;  %v1301_v12 = vadd.f32 %v1287_v10, %v1243_v11  ;;  %v1420_v11 = vld [vmem:[#allocation3 + $0x6] sm:$0x1] }
0x18d3   :  { %v1289_v13 = vsel %vm1288_vm6, %v2432_v1, 5 }
0x18d4   :  { %v1290_v14 = vsel %vm1102_vm5, %v1289_v13, 2147483647  ;;  %v1306_v15 = vrot.slane %v1301_v12, %v2441_v19 }
0x18d5   :  { %v1291_v16 = vrot.slane %v1290_v14, 4 }
0x18d6   :  { %v1307_v17 = vadd.f32 %v1306_v15, %v2421_v55 }
0x18d7   :  { %vm1292_vm7 = vcmp.lt.s32.totalorder %v1290_v14, %v1291_v16 }
0x18d8   :  { %v1293_v18 = vsel %vm1292_vm7, %v1290_v14, %v1291_v16  ;;  %1308 = vxpose.xlu1.b32.start.end [1/1] (short) (narrow) %v1307_v17, 8 }
0x18d9   :  { %v1294_v20 = vrot.slane %v1293_v18, 2 }
0x18db   :  { %vm1295_vm8 = vcmp.lt.s32.totalorder %v1293_v18, %v1294_v20 }
0x18dc   :  { %v1296_v6 = vsel %vm1295_vm8, %v1293_v18, %v1294_v20 }
0x18dd   :  { %v1297_v21 = vrot.slane %v1296_v6, 1 }
0x18df   :  { %vm1298_vm10 = vcmp.lt.s32.totalorder %v1296_v6, %v1297_v21 }
0x18e0   :  { %v1299_v22 = vsel %vm1298_vm10, %v1296_v6, %v1297_v21  ;;  %vm1542_vm10 = vcmp.eq.s32.totalorder %v2416_v53, 4 }
0x18e1   :  { %1300 = vst.msk [vmem:[#allocation4 + $0x3] sm:$0x1] %vm1122_vm9, %v1299_v22 }
0x1958   :  { %v1324_v23 = vpop.trf.xlu1 }
0x1959   :  { %v1340_v24 = vsel %vm1102_vm5, %v1324_v23, -inf }
0x195a   :  { %v1341_v25 = vrot.slane %v1340_v24, 4 }
0x195c   :  { %v1342_v26 = vmax.f32 %v1340_v24, %v1341_v25 }
0x195e   :  { %v1343_v27 = vrot.slane %v1342_v26, 2 }
0x1960   :  { %v1344_v28 = vmax.f32 %v1342_v26, %v1343_v27 }
0x1962   :  { %v1345_v29 = vrot.slane %v1344_v28, 1 }
0x1964   :  { %v1346_v30 = vmax.f32 %v1344_v28, %v1345_v29 }
0x1966   :  { %vm1347_vm11 = vcmp.eq.f32.partialorder %v1324_v23, %v1346_v30  ;;  %v1360_v32 = vadd.f32 %v1346_v30, %v1302_v31  ;;  %v1539_v30 = vrot.slane %v2421_v55, 4  ;;  %v1479_v31 = vld [vmem:[#allocation3 + $0x7] sm:$0x1] }
0x1967   :  { %v1348_v33 = vsel %vm1347_vm11, %v2432_v1, 5 }
0x1968   :  { %v1349_v34 = vsel %vm1102_vm5, %v1348_v33, 2147483647  ;;  %v1365_v35 = vrot.slane %v1360_v32, %v2441_v19 }
0x1969   :  { %v1350_v36 = vrot.slane %v1349_v34, 4 }
0x196a   :  { %v1366_v37 = vadd.f32 %v1365_v35, %v2421_v55 }
0x196b   :  { %vm1351_vm12 = vcmp.lt.s32.totalorder %v1349_v34, %v1350_v36 }
0x196c   :  { %v1352_v38 = vsel %vm1351_vm12, %v1349_v34, %v1350_v36  ;;  %1367 = vxpose.xlu0.b32.start.end [1/1] (short) (narrow) %v1366_v37, 8  ;;  %vm1543_vm12 = vmor %vm1542_vm10, %vm1066_vm4 }
0x196d   :  { %v1353_v39 = vrot.slane %v1352_v38, 2 }
0x196f   :  { %vm1354_vm13 = vcmp.lt.s32.totalorder %v1352_v38, %v1353_v39 }
0x1970   :  { %v1355_v40 = vsel %vm1354_vm13, %v1352_v38, %v1353_v39 }
0x1971   :  { %v1356_v41 = vrot.slane %v1355_v40, 1 }
0x1973   :  { %vm1357_vm14 = vcmp.lt.s32.totalorder %v1355_v40, %v1356_v41 }
0x1974   :  { %v1358_v42 = vsel %vm1357_vm14, %v1355_v40, %v1356_v41 }
0x1975   :  { %1359 = vst.msk [vmem:[#allocation4 + $0x4] sm:$0x1] %vm1122_vm9, %v1358_v42 }
0x19ec   :  { %v1383_v43 = vpop.trf.xlu0 }
0x19ed   :  { %v1399_v44 = vsel %vm1102_vm5, %v1383_v43, -inf }
0x19ee   :  { %v1400_v45 = vrot.slane %v1399_v44, 4 }
0x19f0   :  { %v1401_v46 = vmax.f32 %v1399_v44, %v1400_v45 }
0x19f2   :  { %v1402_v47 = vrot.slane %v1401_v46, 2 }
0x19f4   :  { %v1403_v48 = vmax.f32 %v1401_v46, %v1402_v47 }
0x19f6   :  { %v1404_v49 = vrot.slane %v1403_v48, 1 }
0x19f8   :  { %v1405_v50 = vmax.f32 %v1403_v48, %v1404_v49 }
0x19fa   :  { %vm1406_vm15 = vcmp.eq.f32.partialorder %v1383_v43, %v1405_v50  ;;  %v1419_v52 = vadd.f32 %v1405_v50, %v1361_v51 }
0x19fb   :  { %v1407_v54 = vsel %vm1406_vm15, %v2432_v1, 5 }
0x19fc   :  { %v1408_v56 = vsel %vm1102_vm5, %v1407_v54, 2147483647  ;;  %v1424_v57 = vrot.slane %v1419_v52, %v2441_v19 }
0x19fd   :  { %v1409_v3 = vrot.slane %v1408_v56, 4 }
0x19fe   :  { %v1425_v4 = vadd.f32 %v1424_v57, %v2421_v55 }
0x19ff   :  { %vm1410_vm0 = vcmp.lt.s32.totalorder %v1408_v56, %v1409_v3 }
0x1a00   :  { %v1411_v58 = vsel %vm1410_vm0, %v1408_v56, %v1409_v3  ;;  %1426 = vxpose.xlu1.b32.start.end [1/1] (short) (narrow) %v1425_v4, 8  ;;  %vm1565_vm0 = vcmask 0  }
0x1a01   :  { %v1412_v59 = vrot.slane %v1411_v58, 2 }
0x1a03   :  { %vm1413_vm1 = vcmp.lt.s32.totalorder %v1411_v58, %v1412_v59 }
0x1a04   :  { %v1414_v60 = vsel %vm1413_vm1, %v1411_v58, %v1412_v59 }
0x1a05   :  { %v1415_v61 = vrot.slane %v1414_v60, 1 }
0x1a07   :  { %vm1416_vm2 = vcmp.lt.s32.totalorder %v1414_v60, %v1415_v61 }
0x1a08   :  { %v1417_v7 = vsel %vm1416_vm2, %v1414_v60, %v1415_v61 }
0x1a09   :  { %1418 = vst.msk [vmem:[#allocation4 + $0x5] sm:$0x1] %vm1122_vm9, %v1417_v7 }
0x1a80   :  { %v1442_v62 = vpop.trf.xlu1 }
0x1a81   :  { %v1458_v63 = vsel %vm1102_vm5, %v1442_v62, -inf }
0x1a82   :  { %v1459_v0 = vrot.slane %v1458_v63, 4 }
0x1a84   :  { %v1460_v2 = vmax.f32 %v1458_v63, %v1459_v0 }
0x1a86   :  { %v1461_v5 = vrot.slane %v1460_v2, 2 }
0x1a88   :  { %v1462_v8 = vmax.f32 %v1460_v2, %v1461_v5 }
0x1a8a   :  { %v1463_v9 = vrot.slane %v1462_v8, 1 }
0x1a8c   :  { %v1464_v10 = vmax.f32 %v1462_v8, %v1463_v9 }
0x1a8e   :  { %vm1465_vm3 = vcmp.eq.f32.partialorder %v1442_v62, %v1464_v10  ;;  %v1478_v12 = vadd.f32 %v1464_v10, %v1420_v11 }
0x1a8f   :  { %v1466_v13 = vsel %vm1465_vm3, %v2432_v1, 5 }
0x1a90   :  { %v1467_v14 = vsel %vm1102_vm5, %v1466_v13, 2147483647  ;;  %v1483_v15 = vrot.slane %v1478_v12, %v2441_v19 }
0x1a91   :  { %v1468_v16 = vrot.slane %v1467_v14, 4 }
0x1a92   :  { %v1484_v17 = vadd.f32 %v1483_v15, %v2421_v55 }
0x1a93   :  { %vm1469_vm6 = vcmp.lt.s32.totalorder %v1467_v14, %v1468_v16 }
0x1a94   :  { %v1470_v18 = vsel %vm1469_vm6, %v1467_v14, %v1468_v16  ;;  %1485 = vxpose.xlu0.b32.start.end [1/1] (short) (narrow) %v1484_v17, 8 }
0x1a95   :  { %v1471_v20 = vrot.slane %v1470_v18, 2 }
0x1a97   :  { %vm1472_vm7 = vcmp.lt.s32.totalorder %v1470_v18, %v1471_v20 }
0x1a98   :  { %v1473_v6 = vsel %vm1472_vm7, %v1470_v18, %v1471_v20 }
0x1a99   :  { %v1474_v21 = vrot.slane %v1473_v6, 1 }
0x1a9b   :  { %vm1475_vm8 = vcmp.lt.s32.totalorder %v1473_v6, %v1474_v21 }
0x1a9c   :  { %v1476_v22 = vsel %vm1475_vm8, %v1473_v6, %v1474_v21 }
0x1a9d   :  { %1477 = vst.msk [vmem:[#allocation4 + $0x6] sm:$0x1] %vm1122_vm9, %v1476_v22 }
0x1aa4   :  { %v1587_v10 = vld [vmem:[#allocation4 + $0x6] sm:$0x1] }
0x1b14   :  { %v1501_v23 = vpop.trf.xlu0 }
0x1b15   :  { %v1517_v24 = vsel %vm1102_vm5, %v1501_v23, -inf }
0x1b16   :  { %v1518_v25 = vrot.slane %v1517_v24, 4 }
0x1b18   :  { %v1519_v26 = vmax.f32 %v1517_v24, %v1518_v25  ;;  %v1606_v24 = vld [vmem:[#allocation4 + $0x5] sm:$0x1] }
0x1b1a   :  { %v1520_v19 = vrot.slane %v1519_v26, 2 }
0x1b1c   :  { %v1521_v27 = vmax.f32 %v1519_v26, %v1520_v19 }
0x1b1e   :  { %v1522_v28 = vrot.slane %v1521_v27, 1 }
0x1b20   :  { %v1523_v29 = vmax.f32 %v1521_v27, %v1522_v28 }
0x1b22   :  { %vm1524_vm11 = vcmp.eq.f32.partialorder %v1501_v23, %v1523_v29  ;;  %v1537_v32 = vadd.f32 %v1523_v29, %v1479_v31 }
0x1b23   :  { %v1525_v33 = vsel %vm1524_vm11, %v2432_v1, 5 }
0x1b24   :  { %v1526_v34 = vsel %vm1102_vm5, %v1525_v33, 2147483647  ;;  %v1541_v35 = vadd.f32 %v1539_v30, %v1537_v32 }
0x1b25   :  { %v1527_v36 = vrot.slane %v1526_v34, 4 }
0x1b26   :  { %v1544_v37 = vsel %vm1543_vm12, -10000.0, %v1541_v35 }
0x1b27   :  { %vm1528_vm13 = vcmp.lt.s32.totalorder %v1526_v34, %v1527_v36  ;;  %v1545_v38 = vsel %vm1122_vm9, %v1544_v37, -inf }
0x1b28   :  { %v1529_v39 = vsel %vm1528_vm13, %v1526_v34, %v1527_v36  ;;  %1546 = vmax.xlane.f32.xlu1 %v1545_v38 }
0x1b29   :  { %v1530_v55 = vrot.slane %v1529_v39, 2 }
0x1b2b   :  { %vm1531_vm14 = vcmp.lt.s32.totalorder %v1529_v39, %v1530_v55 }
0x1b2c   :  { %v1532_v40 = vsel %vm1531_vm14, %v1529_v39, %v1530_v55 }
0x1b2d   :  { %v1533_v41 = vrot.slane %v1532_v40, 1 }
0x1b2f   :  { %vm1534_vm15 = vcmp.lt.s32.totalorder %v1532_v40, %v1533_v41 }
0x1b30   :  { %v1535_v42 = vsel %vm1534_vm15, %v1532_v40, %v1533_v41 }
0x1b31   :  { %1536 = vst.msk [vmem:[#allocation4 + $0x7] sm:$0x1] %vm1122_vm9, %v1535_v42 }
0x1b38   :  { %v1568_v3 = vld [vmem:[#allocation4 + $0x7] sm:$0x1] }
0x1bb5   :  { %v1547_v1 = vpop.xlane.xlu1 %1546 }
0x1bb6   :  { %vm1548_vm4 = vcmp.eq.f32.partialorder %v1544_v37, %v1547_v1  ;;  %1566 = vst.msk [vmem:[#allocation12] sm:$0x1] %vm1565_vm0, %v1547_v1  ;;  %v1625_v37 = vld [vmem:[#allocation4 + $0x4] sm:$0x1] }
0x1bb7   :  { %v1549_v43 = vsel %vm1548_vm4, %v2416_v53, 5 }
0x1bb8   :  { %v1550_v44 = vsel %vm1122_vm9, %v1549_v43, 2147483647 }
0x1bb9   :  { %v1552_v45 = vshra.s32 %v1550_v44, 16  ;;  %v1551_v47 = vand.u32 65535, %v1550_v44 }
0x1bbb   :  { %v1554_v46 = vcvt.s32.f32 %v1552_v45  ;;  %v1553_v49 = vcvt.s32.f32 %v1551_v47 }
0x1bbd   :  { %1555 = vmin.xlane.f32.xlu0 %v1554_v46 }
0x1c4a   :  { %v1556_v48 = vpop.xlane.xlu0 %1555 }
0x1c4b   :  { %vm1557_vm5 = vcmp.eq.f32.partialorder %v1554_v46, %v1556_v48  ;;  %v1562_v51 = vcvt.f32.s32 %v1556_v48 }
0x1c4c   :  { %v1558_v50 = vsel %vm1557_vm5, %v1553_v49, inf  ;;  %v1644_v49 = vld [vmem:[#allocation4 + $0x3] sm:$0x1] }
0x1c4d   :  { %1559 = vmin.xlane.f32.xlu1 %v1558_v50  ;;  %v1563_v54 = vshll.u32 %v1562_v51, 16 }
0x1cda   :  { %v1560_v52 = vpop.xlane.xlu1 %1559 }
0x1cdb   :  { %v1561_v56 = vcvt.f32.s32 %v1560_v52 }
0x1cdd   :  { %v1564_v57 = vadd.s32 %v1563_v54, %v1561_v56 }
0x1cdf   :  { %1567 = vst.msk [vmem:[%s2566_s9 + $0x8] sm:$0x1] %vm1565_vm0, %v1564_v57  ;;  %vm1569_vm1 = vcmp.eq.s32.totalorder %v2416_v53, %v1564_v57 }
0x1ce0   :  { %v1570_v4 = vsel %vm1569_vm1, %v1568_v3, 0 }
0x1ce1   :  { %v1571_v58 = vsel %vm1122_vm9, %v1570_v4, 2147483648 }
0x1ce2   :  { %v1573_v59 = vshra.s32 %v1571_v58, 16  ;;  %v1572_v61 = vand.u32 65535, %v1571_v58 }
0x1ce4   :  { %v1575_v60 = vcvt.s32.f32 %v1573_v59  ;;  %v1574_v62 = vcvt.s32.f32 %v1572_v61 }
0x1ce6   :  { %1576 = vmax.xlane.f32.xlu1 %v1575_v60 }
0x1d73   :  { %v1577_v7 = vpop.xlane.xlu1 %1576 }
0x1d74   :  { %vm1578_vm2 = vcmp.eq.f32.partialorder %v1575_v60, %v1577_v7  ;;  %v1583_v0 = vcvt.f32.s32 %v1577_v7 }
0x1d75   :  { %v1579_v63 = vsel %vm1578_vm2, %v1574_v62, -inf  ;;  %v1663_v62 = vld [vmem:[#allocation4 + $0x2] sm:$0x1] }
0x1d76   :  { %1580 = vmax.xlane.f32.xlu0 %v1579_v63  ;;  %v1584_v5 = vshll.u32 %v1583_v0, 16 }
0x1e03   :  { %v1581_v2 = vpop.xlane.xlu0 %1580 }
0x1e04   :  { %v1582_v8 = vcvt.f32.s32 %v1581_v2 }
0x1e06   :  { %v1585_v9 = vadd.s32 %v1584_v5, %v1582_v8 }
0x1e08   :  { %1586 = vst.msk [vmem:[%s2566_s9 + $0x7] sm:$0x1] %vm1565_vm0, %v1585_v9  ;;  %vm1588_vm3 = vcmp.eq.s32.totalorder %v2416_v53, %v1585_v9 }
0x1e09   :  { %v1589_v11 = vsel %vm1588_vm3, %v1587_v10, 0 }
0x1e0a   :  { %v1590_v12 = vsel %vm1122_vm9, %v1589_v11, 2147483648 }
0x1e0b   :  { %v1592_v13 = vshra.s32 %v1590_v12, 16  ;;  %v1591_v15 = vand.u32 65535, %v1590_v12 }
0x1e0d   :  { %v1594_v14 = vcvt.s32.f32 %v1592_v13  ;;  %v1593_v17 = vcvt.s32.f32 %v1591_v15 }
0x1e0f   :  { %1595 = vmax.xlane.f32.xlu1 %v1594_v14 }
0x1e9c   :  { %v1596_v16 = vpop.xlane.xlu1 %1595 }
0x1e9d   :  { %vm1597_vm6 = vcmp.eq.f32.partialorder %v1594_v14, %v1596_v16  ;;  %v1602_v20 = vcvt.f32.s32 %v1596_v16 }
0x1e9e   :  { %v1598_v18 = vsel %vm1597_vm6, %v1593_v17, -inf  ;;  %v1682_v17 = vld [vmem:[#allocation4 + $0x1] sm:$0x1] }
0x1e9f   :  { %1599 = vmax.xlane.f32.xlu0 %v1598_v18  ;;  %v1603_v21 = vshll.u32 %v1602_v20, 16 }
0x1f2c   :  { %v1600_v6 = vpop.xlane.xlu0 %1599 }
0x1f2d   :  { %v1601_v22 = vcvt.f32.s32 %v1600_v6 }
0x1f2f   :  { %v1604_v23 = vadd.s32 %v1603_v21, %v1601_v22 }
0x1f31   :  { %1605 = vst.msk [vmem:[%s2566_s9 + $0x6] sm:$0x1] %vm1565_vm0, %v1604_v23  ;;  %vm1607_vm7 = vcmp.eq.s32.totalorder %v2416_v53, %v1604_v23 }
0x1f32   :  { %v1608_v25 = vsel %vm1607_vm7, %v1606_v24, 0 }
0x1f33   :  { %v1609_v26 = vsel %vm1122_vm9, %v1608_v25, 2147483648 }
0x1f34   :  { %v1611_v19 = vshra.s32 %v1609_v26, 16  ;;  %v1610_v28 = vand.u32 65535, %v1609_v26 }
0x1f36   :  { %v1613_v27 = vcvt.s32.f32 %v1611_v19  ;;  %v1612_v30 = vcvt.s32.f32 %v1610_v28 }
0x1f38   :  { %1614 = vmax.xlane.f32.xlu1 %v1613_v27 }
0x1fc5   :  { %v1615_v29 = vpop.xlane.xlu1 %1614 }
0x1fc6   :  { %vm1616_vm8 = vcmp.eq.f32.partialorder %v1613_v27, %v1615_v29  ;;  %v1621_v32 = vcvt.f32.s32 %v1615_v29 }
0x1fc7   :  { %v1617_v31 = vsel %vm1616_vm8, %v1612_v30, -inf  ;;  %v1701_v30 = vld [vmem:[#allocation4] sm:$0x1] }
0x1fc8   :  { %1618 = vmax.xlane.f32.xlu0 %v1617_v31  ;;  %v1622_v34 = vshll.u32 %v1621_v32, 16 }
0x2055   :  { %v1619_v33 = vpop.xlane.xlu0 %1618 }
0x2056   :  { %v1620_v35 = vcvt.f32.s32 %v1619_v33 }
0x2058   :  { %v1623_v36 = vadd.s32 %v1622_v34, %v1620_v35 }
0x205a   :  { %1624 = vst.msk [vmem:[%s2566_s9 + $0x5] sm:$0x1] %vm1565_vm0, %v1623_v36  ;;  %vm1626_vm10 = vcmp.eq.s32.totalorder %v2416_v53, %v1623_v36 }
0x205b   :  { %v1627_v38 = vsel %vm1626_vm10, %v1625_v37, 0 }
0x205c   :  { %v1628_v39 = vsel %vm1122_vm9, %v1627_v38, 2147483648 }
0x205d   :  { %v1630_v55 = vshra.s32 %v1628_v39, 16  ;;  %v1629_v41 = vand.u32 65535, %v1628_v39 }
0x205f   :  { %v1632_v40 = vcvt.s32.f32 %v1630_v55  ;;  %v1631_v1 = vcvt.s32.f32 %v1629_v41 }
0x2061   :  { %1633 = vmax.xlane.f32.xlu1 %v1632_v40 }
0x20ee   :  { %v1634_v42 = vpop.xlane.xlu1 %1633 }
0x20ef   :  { %vm1635_vm11 = vcmp.eq.f32.partialorder %v1632_v40, %v1634_v42  ;;  %v1640_v44 = vcvt.f32.s32 %v1634_v42 }
0x20f0   :  { %v1636_v43 = vsel %vm1635_vm11, %v1631_v1, -inf }
0x20f1   :  { %1637 = vmax.xlane.f32.xlu0 %v1636_v43  ;;  %v1641_v46 = vshll.u32 %v1640_v44, 16 }
0x217e   :  { %v1638_v45 = vpop.xlane.xlu0 %1637 }
0x217f   :  { %v1639_v47 = vcvt.f32.s32 %v1638_v45 }
0x2181   :  { %v1642_v48 = vadd.s32 %v1641_v46, %v1639_v47 }
0x2183   :  { %1643 = vst.msk [vmem:[%s2566_s9 + $0x4] sm:$0x1] %vm1565_vm0, %v1642_v48  ;;  %vm1645_vm12 = vcmp.eq.s32.totalorder %v2416_v53, %v1642_v48 }
0x2184   :  { %v1646_v50 = vsel %vm1645_vm12, %v1644_v49, 0 }
0x2185   :  { %v1647_v51 = vsel %vm1122_vm9, %v1646_v50, 2147483648 }
0x2186   :  { %v1649_v52 = vshra.s32 %v1647_v51, 16  ;;  %v1648_v56 = vand.u32 65535, %v1647_v51 }
0x2188   :  { %v1651_v54 = vcvt.s32.f32 %v1649_v52  ;;  %v1650_v3 = vcvt.s32.f32 %v1648_v56 }
0x218a   :  { %1652 = vmax.xlane.f32.xlu1 %v1651_v54 }
0x2217   :  { %v1653_v57 = vpop.xlane.xlu1 %1652 }
0x2218   :  { %vm1654_vm13 = vcmp.eq.f32.partialorder %v1651_v54, %v1653_v57  ;;  %v1659_v58 = vcvt.f32.s32 %v1653_v57 }
0x2219   :  { %v1655_v4 = vsel %vm1654_vm13, %v1650_v3, -inf }
0x221a   :  { %1656 = vmax.xlane.f32.xlu0 %v1655_v4  ;;  %v1660_v60 = vshll.u32 %v1659_v58, 16 }
0x22a7   :  { %v1657_v59 = vpop.xlane.xlu0 %1656 }
0x22a8   :  { %v1658_v61 = vcvt.f32.s32 %v1657_v59 }
0x22aa   :  { %v1661_v7 = vadd.s32 %v1660_v60, %v1658_v61 }
0x22ac   :  { %1662 = vst.msk [vmem:[%s2566_s9 + $0x3] sm:$0x1] %vm1565_vm0, %v1661_v7  ;;  %vm1664_vm14 = vcmp.eq.s32.totalorder %v2416_v53, %v1661_v7 }
0x22ad   :  { %v1665_v63 = vsel %vm1664_vm14, %v1663_v62, 0 }
0x22ae   :  { %v1666_v0 = vsel %vm1122_vm9, %v1665_v63, 2147483648 }
0x22af   :  { %v1668_v2 = vshra.s32 %v1666_v0, 16  ;;  %v1667_v8 = vand.u32 65535, %v1666_v0 }
0x22b1   :  { %v1670_v5 = vcvt.s32.f32 %v1668_v2  ;;  %v1669_v10 = vcvt.s32.f32 %v1667_v8 }
0x22b3   :  { %1671 = vmax.xlane.f32.xlu1 %v1670_v5 }
0x2340   :  { %v1672_v9 = vpop.xlane.xlu1 %1671 }
0x2341   :  { %vm1673_vm15 = vcmp.eq.f32.partialorder %v1670_v5, %v1672_v9  ;;  %v1678_v12 = vcvt.f32.s32 %v1672_v9 }
0x2342   :  { %v1674_v11 = vsel %vm1673_vm15, %v1669_v10, -inf }
0x2343   :  { %1675 = vmax.xlane.f32.xlu0 %v1674_v11  ;;  %v1679_v14 = vshll.u32 %v1678_v12, 16 }
0x23d0   :  { %v1676_v13 = vpop.xlane.xlu0 %1675 }
0x23d1   :  { %v1677_v15 = vcvt.f32.s32 %v1676_v13 }
0x23d3   :  { %v1680_v16 = vadd.s32 %v1679_v14, %v1677_v15 }
0x23d5   :  { %1681 = vst.msk [vmem:[%s2566_s9 + $0x2] sm:$0x1] %vm1565_vm0, %v1680_v16  ;;  %vm1683_vm4 = vcmp.eq.s32.totalorder %v2416_v53, %v1680_v16 }
0x23d6   :  { %v1684_v18 = vsel %vm1683_vm4, %v1682_v17, 0 }
0x23d7   :  { %v1685_v20 = vsel %vm1122_vm9, %v1684_v18, 2147483648 }
0x23d8   :  { %v1687_v6 = vshra.s32 %v1685_v20, 16  ;;  %v1686_v22 = vand.u32 65535, %v1685_v20 }
0x23da   :  { %v1689_v21 = vcvt.s32.f32 %v1687_v6  ;;  %v1688_v24 = vcvt.s32.f32 %v1686_v22 }
0x23dc   :  { %1690 = vmax.xlane.f32.xlu1 %v1689_v21 }
0x2469   :  { %v1691_v23 = vpop.xlane.xlu1 %1690 }
0x246a   :  { %vm1692_vm5 = vcmp.eq.f32.partialorder %v1689_v21, %v1691_v23  ;;  %v1697_v26 = vcvt.f32.s32 %v1691_v23 }
0x246b   :  { %v1693_v25 = vsel %vm1692_vm5, %v1688_v24, -inf }
0x246c   :  { %1694 = vmax.xlane.f32.xlu0 %v1693_v25  ;;  %v1698_v27 = vshll.u32 %v1697_v26, 16 }
0x24f9   :  { %v1695_v19 = vpop.xlane.xlu0 %1694 }
0x24fa   :  { %v1696_v28 = vcvt.f32.s32 %v1695_v19 }
0x24fc   :  { %v1699_v29 = vadd.s32 %v1698_v27, %v1696_v28 }
0x24fe   :  { %1700 = vst.msk [vmem:[%s2566_s9 + $0x1] sm:$0x1] %vm1565_vm0, %v1699_v29  ;;  %vm1702_vm1 = vcmp.eq.s32.totalorder %v2416_v53, %v1699_v29 }
0x24ff   :  { %v1703_v31 = vsel %vm1702_vm1, %v1701_v30, 0 }
0x2500   :  { %v1704_v32 = vsel %vm1122_vm9, %v1703_v31, 2147483648 }
0x2501   :  { %v1706_v33 = vshra.s32 %v1704_v32, 16  ;;  %v1705_v35 = vand.u32 65535, %v1704_v32 }
0x2503   :  { %v1708_v34 = vcvt.s32.f32 %v1706_v33  ;;  %v1707_v37 = vcvt.s32.f32 %v1705_v35 }
0x2505   :  { %1709 = vmax.xlane.f32.xlu1 %v1708_v34 }
0x2592   :  { %v1710_v36 = vpop.xlane.xlu1 %1709 }
0x2593   :  { %vm1711_vm2 = vcmp.eq.f32.partialorder %v1708_v34, %v1710_v36 }
0x2594   :  { %v1712_v38 = vsel %vm1711_vm2, %v1707_v37, -inf }
0x2595   :  { %1713 = vmax.xlane.f32.xlu0 %v1712_v38 }
0x2596   :  { %2131 = shalt.err (!%p2128_p11)
}
0x2597   :  { %s2132_s16 = scalar_lea.hbm %s2567_s10, 16 }
0x2598   :  { %p2133_p12 = scmp.ne.s32.totalorder %s2567_s10, %s2132_s16  ;;  %p2136_p13 = scmp.lt.u32.totalorder %s2132_s16, %s2567_s10 }
0x259a   :  { %p2138_p0 = pnand %p2136_p13, %p2133_p12 }
0x259c   :  { %2141 = shalt.err (!%p2138_p0)
}
0x259d   :  { %1731 = dma.vmem_to_hbm [thread:$0]  %s1729_s4, 16, %s2567_s10, [#allocation7]   ;;  %v1716_v53 = vcvt.f32.s32 %v1710_v36 }
0x259f   :  { %v1717_v55 = vshll.u32 %v1716_v53, 16 }
0x2622   :  { %v1714_v39 = vpop.xlane.xlu0 %1713 }
0x2623   :  { %v1715_v40 = vcvt.f32.s32 %v1714_v39 }
0x2625   :  { %v1718_v41 = vadd.s32 %v1717_v55, %v1715_v40 }
0x2627   :  { %1719 = vst.msk [vmem:[%s2566_s9] sm:$0x1] %vm1565_vm0, %v1718_v41 }
0x2628   :  { %2148 = dma.done.wait [#allocation7], 16  }
0x2629   :  { %2149 = vsyncadd [#allocation7], 4294967280 }
0x262a   :  { %1737 = vsyncpa [#allocation6], 1 }
0x262b   :  { %1738 = vsyncpa [#allocation11], 1 }
0x262c   :  { %1739 = vsyncpa [#allocation7], 1 }
0x262d   :  { %1740 = vsyncpa [#allocation8], 1 }

</bundles_post_ra>
